<compile_context>
chip_gen: v5e
topology: v5e:2x2
jax: 0.10.0
libtpu: 0.0.40
codegen_flags: <defaults>
</compile_context>

<pallas_src>
import functools

import jax
import jax.numpy as jnp
from jax.experimental import pallas as pl
from jax.experimental.pallas import tpu as pltpu


def _round_up(x, m):
    return (x + m - 1) // m * m


def bpr_kernel(idx_ref, dtab_ref, itab_ref, w1_ref, w2_ref, out_ref):
    """One batch tile; activations in transposed (feature, batch_tile) layout.

    idx_ref : (2, TB)      int32  row 0 = design indices, row 1 = item indices
    dtab_ref: (DF_p, ND)   bf16   design table^T; row DF is all-ones (carries b1)
    itab_ref: (DIM_p, NI)  bf16   item-embedding table^T
    w1_ref  : (H_p, DF_p)  bf16   w1^T; column DF holds b1, [H, DF] = 1 (b2 hook)
    w2_ref  : (DIM_p, H_p) bf16   w2^T; column H holds b2
    out_ref : (1, TB)      f32    lane-dense per-example scores
    """
    didx = idx_ref[0:1, :]                       # (1, TB)
    iidx = idx_ref[1:2, :]                       # (1, TB)
    tb = didx.shape[1]
    nd = dtab_ref.shape[1]
    ni = itab_ref.shape[1]
    cd = dtab_ref.dtype

    # Fused embedding gathers: one-hot selection matmuls on the MXU (exact in bf16).
    d_oh = (jax.lax.broadcasted_iota(jnp.int32, (nd, tb), 0) == didx).astype(cd)
    i_oh = (jax.lax.broadcasted_iota(jnp.int32, (ni, tb), 0) == iidx).astype(cd)
    x_t = jnp.dot(dtab_ref[...], d_oh, preferred_element_type=jnp.float32)     # (DF_p, TB)
    item_t = jnp.dot(itab_ref[...], i_oh, preferred_element_type=jnp.float32)  # (DIM_p, TB)

    # MLP with biases folded into the weights (x_t row DF == 1 for every example):
    #   h = relu(w1 x + b1); row H of h is the constant 1 that carries b2.
    h_t = jnp.dot(w1_ref[...], x_t.astype(cd), preferred_element_type=jnp.float32)
    h_t = jnp.maximum(h_t, 0.0)                                                 # (H_p, TB)
    y_t = jnp.dot(w2_ref[...], h_t.astype(cd), preferred_element_type=jnp.float32)

    # Per-example score = sum over the feature (sublane) axis -> lane-dense store.
    out_ref[...] = jnp.sum(y_t * item_t, axis=0, keepdims=True)                 # (1, TB)


def prepare_params(params, compute_dtype=jnp.bfloat16):
    """Pad + transpose + bias-fold the parameters once into kernel-ready layouts."""
    dtab = params["design_vectors"]      # (ND, DF)   frozen design-vector table
    itab = params["item_embedding"]      # (NI, DIM)
    w1, b1 = params["w1"], params["b1"]  # (DF, H), (1, H)
    w2, b2 = params["w2"], params["b2"]  # (H, DIM), (1, DIM)

    nd, df = dtab.shape
    ni, dim = itab.shape
    h = w1.shape[1]

    df_p = _round_up(df + 1, 128)   # +1: all-ones row that carries b1 through the gather
    h_p = _round_up(h + 1, 128)     # +1: constant-1 hook row that carries b2 into y
    dim_p = _round_up(dim, 64)

    # Design table transposed, with a ones-row at index `df`.
    dtab_t = jnp.zeros((df_p, nd), jnp.float32).at[:df, :].set(dtab.T).at[df, :].set(1.0)
    # w1^T with b1 folded into column `df`, and the constant-1 hook at [h, df].
    w1_t = jnp.zeros((h_p, df_p), jnp.float32).at[:h, :df].set(w1.T)
    w1_t = w1_t.at[:h, df].set(b1[0]).at[h, df].set(1.0)
    # w2^T with b2 folded into column `h` (multiplies the constant-1 row of relu(h)).
    w2_t = jnp.zeros((dim_p, h_p), jnp.float32).at[:dim, :h].set(w2.T).at[:dim, h].set(b2[0])
    # Item table transposed (no lane padding of NI).
    itab_t = jnp.zeros((dim_p, ni), jnp.float32).at[:dim, :].set(itab.T)

    cd = compute_dtype
    return {
        "dtab_t": dtab_t.astype(cd),
        "itab_t": itab_t.astype(cd),
        "w1_t": w1_t.astype(cd),
        "w2_t": w2_t.astype(cd),
    }


@functools.partial(jax.jit, static_argnames=("batch_tile",))
def bpr_forward(design_indices, item_indices, prepped, batch_tile=512):
    """Replicates BPRModel.forward: per-example scores of shape (B,)."""
    b = design_indices.shape[0]
    # Effective tile: multiple of 256 (fills the 256-wide MXU on v6e/v7x), but no
    # larger than needed for small batches; callers can raise batch_tile to 1-2K.
    tb = min(batch_tile, max(256, _round_up(b, 256)))
    b_pad = _round_up(b, tb)

    idx = jnp.stack([design_indices.astype(jnp.int32),
                     item_indices.astype(jnp.int32)])          # (2, B)
    idx = jnp.pad(idx, ((0, 0), (0, b_pad - b)))               # (2, B_pad)

    dtab_t, itab_t = prepped["dtab_t"], prepped["itab_t"]
    w1_t, w2_t = prepped["w1_t"], prepped["w2_t"]

    grid = (b_pad // tb,)
    resident = lambda i: (0, 0)   # same block every step -> stays pinned in VMEM
    batched = lambda i: (0, i)    # tile the batch (lane) axis

    cp_kwargs = dict(dimension_semantics=("parallel",))
    if tb > 2048:
        # (H_p, TB) f32 intermediates outgrow v5e's 16 MiB default scoped VMEM.
        cp_kwargs["vmem_limit_bytes"] = 64 * 1024 * 1024

    out = pl.pallas_call(
        bpr_kernel,
        out_shape=jax.ShapeDtypeStruct((1, b_pad), jnp.float32),
        grid=grid,
        in_specs=[
            pl.BlockSpec((2, tb), batched),        # packed design/item indices
            pl.BlockSpec(dtab_t.shape, resident),  # design table^T   (resident)
            pl.BlockSpec(itab_t.shape, resident),  # item table^T     (resident)
            pl.BlockSpec(w1_t.shape, resident),    # w1^T (+b1 folded, resident)
            pl.BlockSpec(w2_t.shape, resident),    # w2^T (+b2 folded, resident)
        ],
        out_specs=pl.BlockSpec((1, tb), batched),
        compiler_params=pltpu.CompilerParams(**cp_kwargs),
    )(idx, dtab_t, itab_t, w1_t, w2_t)

    return out[0, :b]


def init_params(key, num_items, design_feat_dim, hidden=500, dim=50, num_designs=32):
    k0, k1, k2, k3, k4, k5 = jax.random.split(key, 6)
    # Frozen design-vector table (nn.Embedding.from_pretrained, freeze=True).
    design_vectors = jax.random.normal(k0, (num_designs, design_feat_dim), jnp.float32)
    # Linear(design_feat_dim, 500) stored as (in, out); transposed in prepare_params.
    bound1 = 1.0 / jnp.sqrt(design_feat_dim)
    w1 = jax.random.uniform(k1, (design_feat_dim, hidden), jnp.float32, -bound1, bound1)
    b1 = jax.random.uniform(k2, (1, hidden), jnp.float32, -bound1, bound1)
    # Linear(500, dim)
    bound2 = 1.0 / jnp.sqrt(hidden)
    w2 = jax.random.uniform(k3, (hidden, dim), jnp.float32, -bound2, bound2)
    b2 = jax.random.uniform(k4, (1, dim), jnp.float32, -bound2, bound2)
    # Item embedding, init normal std=0.01.
    item_embedding = 0.01 * jax.random.normal(k5, (num_items, dim), jnp.float32)
    return {
        "design_vectors": design_vectors,
        "w1": w1, "b1": b1, "w2": w2, "b2": b2,
        "item_embedding": item_embedding,
    }


def bpr_forward_ref(design_indices, item_indices, params):
    # Pure-JAX f32 reference mirroring the PyTorch module.
    x = params["design_vectors"][design_indices]
    h = jnp.maximum(x @ params["w1"] + params["b1"], 0.0)
    y = h @ params["w2"] + params["b2"]
    item = params["item_embedding"][item_indices]
    return jnp.sum(y * item, axis=1)


if __name__ == "__main__":
    key = jax.random.PRNGKey(0)
    kp, ki, kj = jax.random.split(key, 3)

    num_items = 16
    num_designs = 32
    design_feat_dim = 32
    hidden = 500
    dim = 50
    batch = 8

    params = init_params(kp, num_items, design_feat_dim, hidden=hidden,
                         dim=dim, num_designs=num_designs)
    prepped = prepare_params(params)   # bf16 weights, f32 MXU accumulation

    design_indices = jax.random.randint(ki, (batch,), 0, num_designs, jnp.int32)
    item_indices = jax.random.randint(kj, (batch,), 0, num_items, jnp.int32)

    out = bpr_forward(design_indices, item_indices, prepped)
    out = jax.block_until_ready(out)

    ref = bpr_forward_ref(design_indices, item_indices, params)
    assert out.shape == (batch,)
    # bf16 weights / activations with f32 accumulation: allow bf16-level drift.
    assert jnp.allclose(out, ref, atol=5e-3, rtol=5e-2), (out, ref)

    print("KERNEL_OK")
</pallas_src>

<mosaic_0001>
module attributes {stable_mosaic.version = 11 : i64} {
  func.func @bpr_kernel(%arg0: i32, %arg1: memref<2x256xi32, #tpu.memory_space<vmem>>, %arg2: memref<128x32xbf16, #tpu.memory_space<vmem>>, %arg3: memref<64x16xbf16, #tpu.memory_space<vmem>>, %arg4: memref<512x128xbf16, #tpu.memory_space<vmem>>, %arg5: memref<64x512xbf16, #tpu.memory_space<vmem>>, %arg6: memref<1x256xf32, #tpu.memory_space<vmem>>) attributes {dimension_semantics = [#tpu.dimension_semantics<parallel>], iteration_bounds = array<i64: 1>, scalar_prefetch = 0 : i64, scratch_operands = 0 : i64, tpu.core_type = #tpu.core_type<tc>, window_params = [{transform_indices = @transform_0, window_bounds = array<i64: 2, 256>}, {pipeline_mode = #tpu.pipeline_mode<synchronous>, transform_indices = @transform_1, window_bounds = array<i64: 128, 32>}, {pipeline_mode = #tpu.pipeline_mode<synchronous>, transform_indices = @transform_2, window_bounds = array<i64: 64, 16>}, {pipeline_mode = #tpu.pipeline_mode<synchronous>, transform_indices = @transform_3, window_bounds = array<i64: 512, 128>}, {pipeline_mode = #tpu.pipeline_mode<synchronous>, transform_indices = @transform_4, window_bounds = array<i64: 64, 512>}, {transform_indices = @transform_5, window_bounds = array<i64: 1, 256>}]} {
    %c0 = arith.constant 0 : index
    %c0_0 = arith.constant 0 : index
    %0 = vector.load %arg1[%c0, %c0_0] : memref<2x256xi32, #tpu.memory_space<vmem>>, vector<1x256xi32>
    %c1 = arith.constant 1 : index
    %c0_1 = arith.constant 0 : index
    %1 = vector.load %arg1[%c1, %c0_1] : memref<2x256xi32, #tpu.memory_space<vmem>>, vector<1x256xi32>
    %2 = tpu.iota {dimensions = array<i32: 0>} : vector<32x256xi32>
    %3 = vector.broadcast %0 : vector<1x256xi32> to vector<32x256xi32>
    %4 = arith.cmpi eq, %2, %3 : vector<32x256xi32>
    %5 = arith.extui %4 : vector<32x256xi1> to vector<32x256xi32>
    %6 = arith.sitofp %5 : vector<32x256xi32> to vector<32x256xf32>
    %7 = arith.truncf %6 : vector<32x256xf32> to vector<32x256xbf16>
    %8 = tpu.iota {dimensions = array<i32: 0>} : vector<16x256xi32>
    %9 = vector.broadcast %1 : vector<1x256xi32> to vector<16x256xi32>
    %10 = arith.cmpi eq, %8, %9 : vector<16x256xi32>
    %11 = arith.extui %10 : vector<16x256xi1> to vector<16x256xi32>
    %12 = arith.sitofp %11 : vector<16x256xi32> to vector<16x256xf32>
    %13 = arith.truncf %12 : vector<16x256xf32> to vector<16x256xbf16>
    %c0_2 = arith.constant 0 : index
    %c0_3 = arith.constant 0 : index
    %14 = vector.load %arg2[%c0_2, %c0_3] : memref<128x32xbf16, #tpu.memory_space<vmem>>, vector<128x32xbf16>
    %cst = arith.constant dense<0.000000e+00> : vector<128x256xf32>
    %15 = tpu.matmul %14, %7, %cst {dimension_numbers = #tpu.dot_dimension_numbers<[1], [0], [0], [1], [0, 0, 1, 1], [], []>} : vector<128x32xbf16>, vector<32x256xbf16>, vector<128x256xf32> -> vector<128x256xf32>
    %c0_4 = arith.constant 0 : index
    %c0_5 = arith.constant 0 : index
    %16 = vector.load %arg3[%c0_4, %c0_5] : memref<64x16xbf16, #tpu.memory_space<vmem>>, vector<64x16xbf16>
    %cst_6 = arith.constant dense<0.000000e+00> : vector<64x256xf32>
    %17 = tpu.matmul %16, %13, %cst_6 {dimension_numbers = #tpu.dot_dimension_numbers<[1], [0], [0], [1], [0, 0, 1, 1], [], []>} : vector<64x16xbf16>, vector<16x256xbf16>, vector<64x256xf32> -> vector<64x256xf32>
    %c0_7 = arith.constant 0 : index
    %c0_8 = arith.constant 0 : index
    %18 = vector.load %arg4[%c0_7, %c0_8] : memref<512x128xbf16, #tpu.memory_space<vmem>>, vector<512x128xbf16>
    %19 = arith.truncf %15 : vector<128x256xf32> to vector<128x256xbf16>
    %cst_9 = arith.constant dense<0.000000e+00> : vector<512x256xf32>
    %20 = tpu.matmul %18, %19, %cst_9 {dimension_numbers = #tpu.dot_dimension_numbers<[1], [0], [0], [1], [0, 0, 1, 1], [], []>} : vector<512x128xbf16>, vector<128x256xbf16>, vector<512x256xf32> -> vector<512x256xf32>
    %cst_10 = arith.constant 0.000000e+00 : f32
    %21 = vector.broadcast %cst_10 : f32 to vector<512x256xf32>
    %22 = arith.maximumf %20, %21 : vector<512x256xf32>
    %c0_11 = arith.constant 0 : index
    %c0_12 = arith.constant 0 : index
    %23 = vector.load %arg5[%c0_11, %c0_12] : memref<64x512xbf16, #tpu.memory_space<vmem>>, vector<64x512xbf16>
    %24 = arith.truncf %22 : vector<512x256xf32> to vector<512x256xbf16>
    %cst_13 = arith.constant dense<0.000000e+00> : vector<64x256xf32>
    %25 = tpu.matmul %23, %24, %cst_13 {dimension_numbers = #tpu.dot_dimension_numbers<[1], [0], [0], [1], [0, 0, 1, 1], [], []>} : vector<64x512xbf16>, vector<512x256xbf16>, vector<64x256xf32> -> vector<64x256xf32>
    %26 = arith.mulf %25, %17 : vector<64x256xf32>
    %cst_14 = arith.constant dense<0.000000e+00> : vector<256xf32>
    %27 = vector.multi_reduction <add>, %26, %cst_14 [0] : vector<64x256xf32> to vector<256xf32>
    %28 = vector.shape_cast %27 : vector<256xf32> to vector<1x256xf32>
    %c0_15 = arith.constant 0 : index
    %c0_16 = arith.constant 0 : index
    %29 = vector.load %arg6[%c0_15, %c0_16] : memref<1x256xf32, #tpu.memory_space<vmem>>, vector<1x256xf32>
    tpu.vector_store %arg6[%c0_15, %c0_16], %28 {strides = array<i32>} : memref<1x256xf32, #tpu.memory_space<vmem>>, vector<1x256xf32>,
    return
  }
  func.func @transform_0(%arg0: i32) -> (i32, i32) {
    %c0_i32 = arith.constant 0 : i32
    %c0_i32_0 = arith.constant 0 : i32
    return %c0_i32, %arg0 : i32, i32
  }
  func.func @transform_1(%arg0: i32) -> (i32, i32) {
    %c0_i32 = arith.constant 0 : i32
    %c0_i32_0 = arith.constant 0 : i32
    %c0_i32_1 = arith.constant 0 : i32
    return %c0_i32, %c0_i32_0 : i32, i32
  }
  func.func @transform_2(%arg0: i32) -> (i32, i32) {
    %c0_i32 = arith.constant 0 : i32
    %c0_i32_0 = arith.constant 0 : i32
    %c0_i32_1 = arith.constant 0 : i32
    return %c0_i32, %c0_i32_0 : i32, i32
  }
  func.func @transform_3(%arg0: i32) -> (i32, i32) {
    %c0_i32 = arith.constant 0 : i32
    %c0_i32_0 = arith.constant 0 : i32
    %c0_i32_1 = arith.constant 0 : i32
    return %c0_i32, %c0_i32_0 : i32, i32
  }
  func.func @transform_4(%arg0: i32) -> (i32, i32) {
    %c0_i32 = arith.constant 0 : i32
    %c0_i32_0 = arith.constant 0 : i32
    %c0_i32_1 = arith.constant 0 : i32
    return %c0_i32, %c0_i32_0 : i32, i32
  }
  func.func @transform_5(%arg0: i32) -> (i32, i32) {
    %c0_i32 = arith.constant 0 : i32
    %c0_i32_0 = arith.constant 0 : i32
    return %c0_i32, %arg0 : i32, i32
  }
}

</mosaic_0001>

<bundles_post_ra>
// kernel: bpr_forward.1
= control target key start
LH: loop header
LB: loop body
LE: loop exit
PB: predicated region body
PF: predicated region fallthrough
CT: control target
= control target key end

     0   :  { %10 = vsyncpa [#allocation3], 0  ;;  %s2468_s0 = inlined_call_operand.vmem [shape: s32[2,256], index: 0, kind: input, shape index: {}]   ;;  %s2469_s1 = inlined_call_operand.vmem [shape: bf16[128,32], index: 1, kind: input, shape index: {}]   ;;  %s2470_s2 = inlined_call_operand.vmem [shape: bf16[64,16], index: 2, kind: input, shape index: {}]   ;;  %s2471_s3 = inlined_call_operand.hbm [shape: bf16[512,128], index: 3, kind: input, shape index: {}]   ;;  %s2472_s4 = inlined_call_operand.hbm [shape: bf16[64,512], index: 4, kind: input, shape index: {}]   ;;  %s2473_s5 = inlined_call_operand.vmem [shape: f32[1,256], index: 5, kind: output, shape index: {}]  }
   0x1   :  { %s22_s20 = sshll.u32 %s2471_s3, 4  ;;  %s23_s20 = int_to_ptr.hbm [resolvable:$true] %s22_s20 }
   0x2   :  { %11 = vsyncpa [#allocation5], 0  ;;  %s1998_s21 = smov [#allocation2]   ;;  %s35_s25 = sshll.u32 %s2472_s4, 4  ;;  %s36_s25 = int_to_ptr.hbm [resolvable:$true] %s35_s25 }
   0x3   :  { %s24_s22 = sshll.u32 %s1998_s21, 4  ;;  %s1999_s26 = smov 64   ;;  %s25_s22 = int_to_ptr.vmem [resolvable:$true] %s24_s22 }
   0x4   :  { %s2000_s27 = smov 4   ;;  %s2001_s28 = smov [#allocation4]  }
   0x5   :  { %30 = dma.hbm_to_vmem [thread:$0]  %s23_s20, 4096, %s25_s22, [#allocation3], %s1999_s26, %s1999_s26, %s2000_s27  }
   0x6   :  { %s37_s29 = sshll.u32 %s2001_s28, 4  ;;  %s2002_s30 = smov 256   ;;  %s38_s29 = int_to_ptr.vmem [resolvable:$true] %s37_s29 }
   0x7   :  { %s2003_s6 = smov 16  }
   0x8   :  { %43 = dma.hbm_to_vmem [thread:$0]  %s36_s25, 2048, %s38_s29, [#allocation5], %s2002_s30, %s2002_s30, %s2003_s6  }
   0x9   :  { %1994 = dma.done.wait [#allocation3], 4096  }
   0xa   :  { %1995 = vsyncadd [#allocation3], 4294963200 }
   0xb   :  { %1996 = dma.done.wait [#allocation5], 2048  }
   0xc   :  { %1997 = vsyncadd [#allocation5], 4294965248  ;;  %v2474_v0 = vlaneseq  ;;  %v53_v4 = vld [vmem:[%s2468_s0] ss:$2 sm:$0x3]  ;;  %vm163_vm12 = vcmask 261120  }
   0xd   :  { %v61_v6 = vperm.slane %v53_v4, 0  ;;  %v62_v7 = vperm.slane %v53_v4, 1  ;;  %v2004_v8 = vmov 1.0|1.0   ;;  %v1863_v9 = vld [vmem:[%s2469_s1] sm:$0xff]  ;;  %v1864_v10 = vld [vmem:[%s2469_s1 + $0x8] sm:$0xff] }
   0xe   :  { %v2042_v1 = vshrl.u32 %v2474_v0, 7  ;;  %v1865_v11 = vld [vmem:[%s2469_s1 + $0x10] sm:$0xff]  ;;  %v1866_v12 = vld [vmem:[%s2469_s1 + $0x18] sm:$0xff]  ;;  %v1867_v13 = vld [vmem:[%s2469_s1 + $0x20] sm:$0xff] }
   0xf   :  { %v1868_v14 = vld [vmem:[%s2469_s1 + $0x28] sm:$0xff]  ;;  %v1869_v15 = vld [vmem:[%s2469_s1 + $0x30] sm:$0xff]  ;;  %v1870_v16 = vld [vmem:[%s2469_s1 + $0x38] sm:$0xff] }
  0x10   :  { %v59_v2 = vadd.s32 16, %v2042_v1  ;;  %v60_v3 = vadd.s32 24, %v2042_v1  ;;  %v2050_v5 = vadd.s32 8, %v2042_v1  ;;  %vm63_vm5 = vcmp.eq.s32.totalorder %v2042_v1, %v61_v6  ;;  %v1574_v29 = vld [vmem:[%s2468_s0 + $0x1] ss:$2 sm:$0x3] }
  0x11   :  { %vm64_vm7 = vcmp.eq.s32.totalorder %v2042_v1, %v62_v7  ;;  %v91_v30 = vperm.slane %v1574_v29, 0  ;;  %v1871_v33 = vld [vmem:[%s2470_s2] sm:$0xff]  ;;  %v1872_v38 = vld [vmem:[%s2470_s2 + $0x8] sm:$0xff]  ;;  %v1873_v43 = vld [vmem:[%s2470_s2 + $0x10] sm:$0xff]  ;;  %v92_v44 = vperm.slane %v1574_v29, 1 }
  0x12   :  { %vm67_vm0 = vcmp.eq.s32.totalorder %v59_v2, %v61_v6  ;;  %vm69_vm1 = vcmp.eq.s32.totalorder %v60_v3, %v61_v6  ;;  %vm68_vm2 = vcmp.eq.s32.totalorder %v59_v2, %v62_v7  ;;  %vm70_vm3 = vcmp.eq.s32.totalorder %v60_v3, %v62_v7  ;;  %v1874_v48 = vld [vmem:[%s2470_s2 + $0x18] sm:$0xff]  ;;  %v1888_v29 = vld [vmem:[#allocation2 + $0x68] sm:$0xff] }
  0x13   :  { %vm1619_vm4 = vmpackc.low %vm69_vm1, %vm67_vm0  ;;  %vm65_vm6 = vcmp.eq.s32.totalorder %v2050_v5, %v61_v6  ;;  %vm66_vm8 = vcmp.eq.s32.totalorder %v2050_v5, %v62_v7  ;;  %vm93_vm13 = vcmp.eq.s32.totalorder %v2042_v1, %v91_v30  ;;  %vm95_vm14 = vcmp.eq.s32.totalorder %v2050_v5, %v91_v30 }
  0x14   :  { %1620 = vmatpush.bf16.msk.msra.mxu0 %vm1619_vm4, %v2004_v8  ;;  %vm1631_vm9 = vmpackc.low %vm70_vm3, %vm68_vm2  ;;  %vm314_vm0 = vcmask 130048   ;;  %vm94_vm1 = vcmp.eq.s32.totalorder %v2042_v1, %v92_v44  ;;  %vm96_vm2 = vcmp.eq.s32.totalorder %v2050_v5, %v92_v44  ;;  %vm1560_vm4 = vcmask 1040384  }
  0x15   :  { %1632 = vmatpush.bf16.msk.msra.mxu1 %vm1631_vm9, %v2004_v8  ;;  %vm1621_vm10 = vmpackc.low %vm65_vm6, %vm63_vm5 }
  0x16   :  { %vm1633_vm11 = vmpackc.low %vm66_vm8, %vm64_vm7 }
  0x17   :  { %vm1659_vm15 = vmpackc.low %vm95_vm14, %vm93_vm13 }
  0x18   :  { %1622 = vmatpush.bf16.msk.msra.mxu0 %vm1621_vm10, %v2004_v8  ;;  %1660 = vmatpush.bf16.msk.msra.mxu2 %vm1659_vm15, %v2004_v8  ;;  %vm1665_vm3 = vmpackc.low %vm96_vm2, %vm94_vm1 }
  0x19   :  { %1634 = vmatpush.bf16.msk.msra.mxu1 %vm1633_vm11, %v2004_v8  ;;  %1666 = vmatpush.bf16.msk.msra.mxu3 %vm1665_vm3, %v2004_v8 }
  0x1b   :  { %1623 = vmatmul.msk.bf16.vlgmr.msra.gmra.mxu0 %vm163_vm12, %v1863_v9  ;;  %1661 = vmatmul.msk.bf16.vlgmr.msra.gmra.mxu2 %vm314_vm0, %v1871_v33 }
  0x1c   :  { %1635 = vmatmul.msk.bf16.vlgmr.msra.gmra.mxu1 %vm163_vm12, %v1863_v9  ;;  %1667 = vmatmul.msk.bf16.vlgmr.msra.gmra.mxu3 %vm314_vm0, %v1871_v33  ;;  %v1880_v9 = vld [vmem:[#allocation2 + $0x28] sm:$0xff] }
  0x2b   :  { %1624 = vmatmul.msk.bf16.gmra.mxu0 %vm163_vm12, %v1864_v10  ;;  %1662 = vmatmul.msk.bf16.gmra.mxu2 %vm314_vm0, %v1872_v38 }
  0x2c   :  { %1636 = vmatmul.msk.bf16.gmra.mxu1 %vm163_vm12, %v1864_v10  ;;  %1668 = vmatmul.msk.bf16.gmra.mxu3 %vm314_vm0, %v1872_v38  ;;  %v1881_v10 = vld [vmem:[#allocation2 + $0x30] sm:$0xff] }
  0x3b   :  { %1625 = vmatmul.msk.bf16.gmra.mxu0 %vm163_vm12, %v1865_v11  ;;  %1663 = vmatmul.msk.bf16.gmra.mxu2 %vm314_vm0, %v1873_v43 }
  0x3c   :  { %1637 = vmatmul.msk.bf16.gmra.mxu1 %vm163_vm12, %v1865_v11  ;;  %1669 = vmatmul.msk.bf16.gmra.mxu3 %vm314_vm0, %v1873_v43  ;;  %v1882_v11 = vld [vmem:[#allocation2 + $0x38] sm:$0xff] }
  0x4b   :  { %1626 = vmatmul.msk.bf16.gmra.mxu0 %vm163_vm12, %v1866_v12  ;;  %1664 = vmatmul.msk.bf16.gmra.mxu2 %vm314_vm0, %v1874_v48 }
  0x4c   :  { %1638 = vmatmul.msk.bf16.gmra.mxu1 %vm163_vm12, %v1866_v12  ;;  %1670 = vmatmul.msk.bf16.gmra.mxu3 %vm314_vm0, %v1874_v48  ;;  %v1883_v12 = vld [vmem:[#allocation2 + $0x40] sm:$0xff] }
  0x5b   :  { %1627 = vmatmul.msk.bf16.gmra.mxu0 %vm163_vm12, %v1867_v13 }
  0x5c   :  { %1639 = vmatmul.msk.bf16.gmra.mxu1 %vm163_vm12, %v1867_v13 }
  0x6b   :  { %1628 = vmatmul.msk.bf16.gmra.mxu0 %vm163_vm12, %v1868_v14 }
  0x6c   :  { %1640 = vmatmul.msk.bf16.gmra.mxu1 %vm163_vm12, %v1868_v14  ;;  %v1884_v14 = vld [vmem:[#allocation2 + $0x48] sm:$0xff] }
  0x7b   :  { %1629 = vmatmul.msk.bf16.gmra.mxu0 %vm163_vm12, %v1869_v15 }
  0x7c   :  { %1641 = vmatmul.msk.bf16.gmra.mxu1 %vm163_vm12, %v1869_v15 }
  0x8b   :  { %1630 = vmatmul.msk.bf16.gmra.mxu0 %vm163_vm12, %v1870_v16 }
  0x8c   :  { %1642 = vmatmul.msk.bf16.gmra.mxu1 %vm163_vm12, %v1870_v16 }
  0x98   :  { %v2100_v17 = vpop.f32.mrf.mxu0 }
  0x99   :  { %v2102_v18 = vpop.f32.mrf.mxu1 }
  0x9e   :  { %v2165_v13 = vpop.f32.mrf.mxu2 }
  0xa0   :  { %v2104_v19 = vpop.f32.mrf.mxu0 }
  0xa1   :  { %v2106_v20 = vpop.f32.mrf.mxu1  ;;  %v449_v7 = vpack.c.bf16 %v2104_v19, %v2100_v17  ;;  %v1885_v17 = vld [vmem:[#allocation2 + $0x50] sm:$0xff]  ;;  %v2173_v19 = vpop.f32.mrf.mxu3 }
  0xa2   :  { %v450_v8 = vpack.c.bf16 %v2106_v20, %v2102_v18  ;;  %v1886_v20 = vld [vmem:[#allocation2 + $0x58] sm:$0xff] }
  0xa6   :  { %v2167_v15 = vpop.f32.mrf.mxu2 }
  0xa8   :  { %v2108_v21 = vpop.f32.mrf.mxu0 }
  0xa9   :  { %v2110_v22 = vpop.f32.mrf.mxu1 }
  0xae   :  { %v2169_v16 = vpop.f32.mrf.mxu2 }
  0xb0   :  { %v2112_v23 = vpop.f32.mrf.mxu0 }
  0xb1   :  { %v2114_v24 = vpop.f32.mrf.mxu1  ;;  %v451_v6 = vpack.c.bf16 %v2112_v23, %v2108_v21 }
  0xb2   :  { %v452_v5 = vpack.c.bf16 %v2114_v24, %v2110_v22  ;;  %v2177_v22 = vpop.f32.mrf.mxu3  ;;  %v1887_v24 = vld [vmem:[#allocation2 + $0x60] sm:$0xff] }
  0xb6   :  { %v2171_v18 = vpop.f32.mrf.mxu2 }
  0xb8   :  { %v2116_v25 = vpop.f32.mrf.mxu0 }
  0xb9   :  { %v2118_v26 = vpop.f32.mrf.mxu1 }
  0xbe   :  { %v2175_v21 = vpop.f32.mrf.mxu2 }
  0xc0   :  { %v2120_v27 = vpop.f32.mrf.mxu0 }
  0xc1   :  { %v2122_v28 = vpop.f32.mrf.mxu1  ;;  %v453_v4 = vpack.c.bf16 %v2120_v27, %v2116_v25  ;;  %v2181_v25 = vpop.f32.mrf.mxu3 }
  0xc2   :  { %v454_v3 = vpack.c.bf16 %v2122_v28, %v2118_v26  ;;  %2475 = vst [vmem:[#allocation8_spill] sm:$0xff] %v2181_v25 }
  0xc6   :  { %v2179_v23 = vpop.f32.mrf.mxu2 }
  0xc8   :  { %v212_v31 = vpop.f32.mrf.mxu0 }
  0xc9   :  { %v261_v32 = vpop.f32.mrf.mxu1  ;;  %v2185_v27 = vpop.f32.mrf.mxu3 }
  0xca   :  { %2476 = vst [vmem:[#allocation9_spill] sm:$0xff] %v2185_v27 }
  0xce   :  { %v2183_v26 = vpop.f32.mrf.mxu2 }
  0xd0   :  { %v214_v34 = vpop.f32.mrf.mxu0 }
  0xd1   :  { %v263_v35 = vpop.f32.mrf.mxu1  ;;  %v455_v2 = vpack.c.bf16 %v214_v34, %v212_v31  ;;  %v2189_v30 = vpop.f32.mrf.mxu3  ;;  %v1889_v34 = vld [vmem:[#allocation2 + $0x70] sm:$0xff] }
  0xd2   :  { %v456_v1 = vpack.c.bf16 %v263_v35, %v261_v32  ;;  %2477 = vst [vmem:[#allocation10_spill] sm:$0xff] %v2189_v30 }
  0xd6   :  { %v2187_v28 = vpop.f32.mrf.mxu2 }
  0xd8   :  { %v217_v36 = vpop.f32.mrf.mxu0 }
  0xd9   :  { %v266_v37 = vpop.f32.mrf.mxu1  ;;  %v2191_v32 = vpop.f32.mrf.mxu3 }
  0xda   :  { %2478 = vst [vmem:[#allocation11_spill] sm:$0xff] %v2191_v32 }
  0xe0   :  { %v219_v39 = vpop.f32.mrf.mxu0 }
  0xe1   :  { %v268_v40 = vpop.f32.mrf.mxu1  ;;  %v457_v63 = vpack.c.bf16 %v219_v39, %v217_v36  ;;  %v2193_v35 = vpop.f32.mrf.mxu3  ;;  %v1890_v39 = vld [vmem:[#allocation2 + $0x78] sm:$0xff] }
  0xe2   :  { %v458_v62 = vpack.c.bf16 %v268_v40, %v266_v37  ;;  %2479 = vst [vmem:[#allocation12_spill] sm:$0xff] %v2193_v35 }
  0xe8   :  { %v222_v41 = vpop.f32.mrf.mxu0 }
  0xe9   :  { %v271_v42 = vpop.f32.mrf.mxu1  ;;  %v2195_v37 = vpop.f32.mrf.mxu3 }
  0xea   :  { %2480 = vst [vmem:[#allocation13_spill] sm:$0xff] %v2195_v37 }
  0xf0   :  { %v224_v45 = vpop.f32.mrf.mxu0 }
  0xf1   :  { %v273_v46 = vpop.f32.mrf.mxu1  ;;  %v459_v61 = vpack.c.bf16 %v224_v45, %v222_v41 }
  0xf2   :  { %v460_v60 = vpack.c.bf16 %v273_v46, %v271_v42 }
  0xf8   :  { %v227_v47 = vpop.f32.mrf.mxu0 }
  0xf9   :  { %v276_v49 = vpop.f32.mrf.mxu1 }
 0x100   :  { %v229_v50 = vpop.f32.mrf.mxu0 }
 0x101   :  { %v278_v51 = vpop.f32.mrf.mxu1  ;;  %v461_v59 = vpack.c.bf16 %v229_v50, %v227_v47  ;;  %v1875_v50 = vld [vmem:[#allocation2] sm:$0xff] }
 0x102   :  { %v462_v58 = vpack.c.bf16 %v278_v51, %v276_v49  ;;  %v1891_v49 = vld [vmem:[#allocation2 + $0x80] sm:$0xff] }
 0x108   :  { %v232_v52 = vpop.f32.mrf.mxu0 }
 0x109   :  { %v281_v53 = vpop.f32.mrf.mxu1 }
 0x110   :  { %v234_v54 = vpop.f32.mrf.mxu0 }
 0x111   :  { %v283_v55 = vpop.f32.mrf.mxu1  ;;  %v463_v56 = vpack.c.bf16 %v234_v54, %v232_v52 }
 0x112   :  { %v464_v57 = vpack.c.bf16 %v283_v55, %v281_v53 }
 0x113   :  { %657 = vmatpush.bf16.msrb.mxu0 %v463_v56  ;;  %1923 = vmatpush.bf16.msrb.mxu2 %v463_v56 }
 0x114   :  { %826 = vmatpush.bf16.msrb.mxu1 %v464_v57  ;;  %1931 = vmatpush.bf16.msrb.mxu3 %v464_v57 }
 0x117   :  { %658 = vmatpush.bf16.msrb.mxu0 %v461_v59  ;;  %1924 = vmatpush.bf16.msrb.mxu2 %v461_v59 }
 0x118   :  { %827 = vmatpush.bf16.msrb.mxu1 %v462_v58  ;;  %1932 = vmatpush.bf16.msrb.mxu3 %v462_v58 }
 0x11b   :  { %659 = vmatpush.bf16.msrb.mxu0 %v459_v61  ;;  %1925 = vmatpush.bf16.msrb.mxu2 %v459_v61 }
 0x11c   :  { %828 = vmatpush.bf16.msrb.mxu1 %v460_v60  ;;  %1933 = vmatpush.bf16.msrb.mxu3 %v460_v60 }
 0x11f   :  { %660 = vmatpush.bf16.msrb.mxu0 %v457_v63  ;;  %1926 = vmatpush.bf16.msrb.mxu2 %v457_v63 }
 0x120   :  { %829 = vmatpush.bf16.msrb.mxu1 %v458_v62  ;;  %1934 = vmatpush.bf16.msrb.mxu3 %v458_v62 }
 0x123   :  { %661 = vmatpush.bf16.msrb.mxu0 %v455_v2  ;;  %1927 = vmatpush.bf16.msrb.mxu2 %v455_v2 }
 0x124   :  { %830 = vmatpush.bf16.msrb.mxu1 %v456_v1  ;;  %1935 = vmatpush.bf16.msrb.mxu3 %v456_v1 }
 0x127   :  { %662 = vmatpush.bf16.msrb.mxu0 %v453_v4  ;;  %1928 = vmatpush.bf16.msrb.mxu2 %v453_v4  ;;  %v1892_v4 = vld [vmem:[#allocation2 + $0x88] sm:$0xff] }
 0x128   :  { %831 = vmatpush.bf16.msrb.mxu1 %v454_v3  ;;  %1936 = vmatpush.bf16.msrb.mxu3 %v454_v3 }
 0x12b   :  { %663 = vmatpush.bf16.msrb.mxu0 %v451_v6  ;;  %1929 = vmatpush.bf16.msrb.mxu2 %v451_v6 }
 0x12c   :  { %832 = vmatpush.bf16.msrb.mxu1 %v452_v5  ;;  %1937 = vmatpush.bf16.msrb.mxu3 %v452_v5  ;;  %v1876_v5 = vld [vmem:[#allocation2 + $0x8] sm:$0xff] }
 0x12f   :  { %664 = vmatpush.bf16.msrb.mxu0 %v449_v7  ;;  %1930 = vmatpush.bf16.msrb.mxu2 %v449_v7 }
 0x130   :  { %833 = vmatpush.bf16.msrb.mxu1 %v450_v8  ;;  %1938 = vmatpush.bf16.msrb.mxu3 %v450_v8 }
 0x132   :  { %690 = vmatmul.bf16.vlgmr.msrb.gmra.mxu2 %v1880_v9  ;;  %665 = vmatmul.bf16.vlgmr.msrb.gmra.mxu0 %v1875_v50 }
 0x133   :  { %859 = vmatmul.bf16.vlgmr.msrb.gmra.mxu3 %v1880_v9  ;;  %834 = vmatmul.bf16.vlgmr.msrb.gmra.mxu1 %v1875_v50 }
 0x142   :  { %695 = vmatmul.bf16.gmra.mxu2 %v1881_v10  ;;  %670 = vmatmul.bf16.gmra.mxu0 %v1876_v5 }
 0x143   :  { %864 = vmatmul.bf16.gmra.mxu3 %v1881_v10  ;;  %839 = vmatmul.bf16.gmra.mxu1 %v1876_v5  ;;  %v1896_v5 = vld [vmem:[#allocation2 + $0xa8] sm:$0xff] }
 0x152   :  { %700 = vmatmul.bf16.gmra.mxu2 %v1882_v11 }
 0x153   :  { %869 = vmatmul.bf16.gmra.mxu3 %v1882_v11 }
 0x162   :  { %705 = vmatmul.bf16.gmra.mxu2 %v1883_v12 }
 0x163   :  { %874 = vmatmul.bf16.gmra.mxu3 %v1883_v12 }
 0x172   :  { %710 = vmatmul.bf16.gmra.mxu2 %v1884_v14 }
 0x173   :  { %879 = vmatmul.bf16.gmra.mxu3 %v1884_v14 }
 0x182   :  { %715 = vmatmul.bf16.gmra.mxu2 %v1885_v17 }
 0x183   :  { %884 = vmatmul.bf16.gmra.mxu3 %v1885_v17 }
 0x192   :  { %720 = vmatmul.bf16.gmra.mxu2 %v1886_v20 }
 0x193   :  { %889 = vmatmul.bf16.gmra.mxu3 %v1886_v20 }
 0x1a2   :  { %725 = vmatmul.bf16.gmra.mxu2 %v1887_v24 }
 0x1a3   :  { %894 = vmatmul.bf16.gmra.mxu3 %v1887_v24  ;;  %v1893_v24 = vld [vmem:[#allocation2 + $0x90] sm:$0xff] }
 0x1b2   :  { %730 = vmatmul.bf16.gmra.mxu2 %v1888_v29 }
 0x1b3   :  { %899 = vmatmul.bf16.gmra.mxu3 %v1888_v29  ;;  %v1877_v29 = vld [vmem:[#allocation2 + $0x10] sm:$0xff] }
 0x1b4   :  { %675 = vmatmul.bf16.gmra.mxu0 %v1877_v29  ;;  %844 = vmatmul.bf16.gmra.mxu1 %v1877_v29 }
 0x1b5   :  { %v691_v31 = vpop.f32.mrf.mxu2 }
 0x1b6   :  { %v860_v40 = vpop.f32.mrf.mxu3  ;;  %v1015_v58 = vmax.f32 %v691_v31, 0.0 }
 0x1b7   :  { %v1016_v42 = vmax.f32 %v860_v40, 0.0 }
 0x1bd   :  { %v693_v33 = vpop.f32.mrf.mxu2 }
 0x1be   :  { %v862_v43 = vpop.f32.mrf.mxu3  ;;  %v1017_v55 = vmax.f32 %v693_v33, 0.0 }
 0x1bf   :  { %v1018_v44 = vmax.f32 %v862_v43, 0.0 }
 0x1c0   :  { %v1149_v60 = vpack.c.bf16 %v1017_v55, %v1015_v58  ;;  %v1879_v58 = vld [vmem:[#allocation2 + $0x20] sm:$0xff] }
 0x1c1   :  { %v2197_v45 = vpack.c.bf16 %v1018_v44, %v1016_v42  ;;  %v1894_v44 = vld [vmem:[#allocation2 + $0x98] sm:$0xff] }
 0x1c2   :  { %735 = vmatmul.bf16.gmra.mxu2 %v1889_v34 }
 0x1c3   :  { %904 = vmatmul.bf16.gmra.mxu3 %v1889_v34 }
 0x1c5   :  { %v696_v36 = vpop.f32.mrf.mxu2 }
 0x1c6   :  { %v865_v53 = vpop.f32.mrf.mxu3  ;;  %v1019_v54 = vmax.f32 %v696_v36, 0.0 }
 0x1c7   :  { %v1020_v59 = vmax.f32 %v865_v53, 0.0 }
 0x1cd   :  { %v698_v38 = vpop.f32.mrf.mxu2 }
 0x1ce   :  { %v1021_v51 = vmax.f32 %v698_v38, 0.0  ;;  %v867_v61 = vpop.f32.mrf.mxu3 }
 0x1cf   :  { %v1022_v62 = vmax.f32 %v867_v61, 0.0 }
 0x1d0   :  { %v1151_v56 = vpack.c.bf16 %v1021_v51, %v1019_v54 }
 0x1d1   :  { %v2199_v63 = vpack.c.bf16 %v1022_v62, %v1020_v59 }
 0x1d2   :  { %740 = vmatmul.bf16.gmra.mxu2 %v1890_v39 }
 0x1d3   :  { %909 = vmatmul.bf16.gmra.mxu3 %v1890_v39 }
 0x1d5   :  { %v701_v41 = vpop.f32.mrf.mxu2 }
 0x1d6   :  { %v1023_v47 = vmax.f32 %v701_v41, 0.0  ;;  %v870_v7 = vpop.f32.mrf.mxu3 }
 0x1d7   :  { %v1024_v9 = vmax.f32 %v870_v7, 0.0 }
 0x1dd   :  { %v703_v46 = vpop.f32.mrf.mxu2 }
 0x1de   :  { %v1025_v48 = vmax.f32 %v703_v46, 0.0  ;;  %v872_v10 = vpop.f32.mrf.mxu3  ;;  %v1878_v46 = vld [vmem:[#allocation2 + $0x18] sm:$0xff] }
 0x1df   :  { %v1026_v11 = vmax.f32 %v872_v10, 0.0  ;;  %680 = vmatmul.bf16.gmra.mxu0 %v1878_v46  ;;  %849 = vmatmul.bf16.gmra.mxu1 %v1878_v46 }
 0x1e0   :  { %v1153_v52 = vpack.c.bf16 %v1025_v48, %v1023_v47 }
 0x1e1   :  { %v2203_v12 = vpack.c.bf16 %v1026_v11, %v1024_v9 }
 0x1e2   :  { %745 = vmatmul.bf16.gmra.mxu2 %v1891_v49  ;;  %1283 = vmatpush.bf16.msra.mxu0 %v1153_v52 }
 0x1e3   :  { %914 = vmatmul.bf16.gmra.mxu3 %v1891_v49 }
 0x1e5   :  { %v706_v57 = vpop.f32.mrf.mxu2 }
 0x1e6   :  { %1284 = vmatpush.bf16.msra.mxu0 %v1151_v56  ;;  %v1027_v2 = vmax.f32 %v706_v57, 0.0  ;;  %v875_v33 = vpop.f32.mrf.mxu3  ;;  %v1895_v57 = vld [vmem:[#allocation2 + $0xa0] sm:$0xff] }
 0x1e7   :  { %v1028_v36 = vmax.f32 %v875_v33, 0.0 }
 0x1ea   :  { %1285 = vmatpush.bf16.msra.mxu0 %v1149_v60 }
 0x1ed   :  { %v708_v1 = vpop.f32.mrf.mxu2 }
 0x1ee   :  { %v1029_v3 = vmax.f32 %v708_v1, 0.0  ;;  %v877_v38 = vpop.f32.mrf.mxu3 }
 0x1ef   :  { %v1030_v39 = vmax.f32 %v877_v38, 0.0  ;;  %685 = vmatmul.bf16.gmra.mxu0 %v1879_v58  ;;  %854 = vmatmul.bf16.gmra.mxu1 %v1879_v58 }
 0x1f0   :  { %v2201_v6 = vpack.c.bf16 %v1029_v3, %v1027_v2 }
 0x1f1   :  { %v2207_v40 = vpack.c.bf16 %v1030_v39, %v1028_v36 }
 0x1f2   :  { %750 = vmatmul.bf16.gmra.mxu2 %v1892_v4 }
 0x1f3   :  { %919 = vmatmul.bf16.gmra.mxu3 %v1892_v4 }
 0x1f5   :  { %v711_v8 = vpop.f32.mrf.mxu2 }
 0x1f6   :  { %v1031_v17 = vmax.f32 %v711_v8, 0.0  ;;  %v880_v48 = vpop.f32.mrf.mxu3 }
 0x1f7   :  { %v1032_v50 = vmax.f32 %v880_v48, 0.0 }
 0x1fd   :  { %v713_v14 = vpop.f32.mrf.mxu2 }
 0x1fe   :  { %v1033_v20 = vmax.f32 %v713_v14, 0.0  ;;  %v882_v51 = vpop.f32.mrf.mxu3 }
 0x1ff   :  { %v1034_v52 = vmax.f32 %v882_v51, 0.0  ;;  %v2225_v51 = vpop.f32.mrf.mxu0 }
 0x200   :  { %v2205_v31 = vpack.c.bf16 %v1033_v20, %v1031_v17  ;;  %v1897_v20 = vld [vmem:[#allocation2 + $0xb0] sm:$0xff] }
 0x201   :  { %v2211_v53 = vpack.c.bf16 %v1034_v52, %v1032_v50 }
 0x202   :  { %755 = vmatmul.bf16.gmra.mxu2 %v1893_v24 }
 0x203   :  { %924 = vmatmul.bf16.gmra.mxu3 %v1893_v24 }
 0x205   :  { %v716_v34 = vpop.f32.mrf.mxu2 }
 0x206   :  { %v1035_v42 = vmax.f32 %v716_v34, 0.0  ;;  %v885_v60 = vpop.f32.mrf.mxu3 }
 0x207   :  { %v1036_v62 = vmax.f32 %v885_v60, 0.0 }
 0x20d   :  { %v718_v41 = vpop.f32.mrf.mxu2 }
 0x20e   :  { %v1037_v43 = vmax.f32 %v718_v41, 0.0  ;;  %v887_v1 = vpop.f32.mrf.mxu3  ;;  %v1898_v41 = vld [vmem:[#allocation2 + $0xb8] sm:$0xff] }
 0x20f   :  { %v1038_v2 = vmax.f32 %v887_v1, 0.0 }
 0x210   :  { %v2209_v47 = vpack.c.bf16 %v1037_v43, %v1035_v42 }
 0x211   :  { %v2217_v3 = vpack.c.bf16 %v1038_v2, %v1036_v62 }
 0x212   :  { %760 = vmatmul.bf16.gmra.mxu2 %v1894_v44 }
 0x213   :  { %929 = vmatmul.bf16.gmra.mxu3 %v1894_v44 }
 0x215   :  { %v721_v49 = vpop.f32.mrf.mxu2 }
 0x216   :  { %v1039_v55 = vmax.f32 %v721_v49, 0.0  ;;  %v890_v7 = vpop.f32.mrf.mxu3 }
 0x217   :  { %v1040_v9 = vmax.f32 %v890_v7, 0.0 }
 0x21d   :  { %v723_v54 = vpop.f32.mrf.mxu2 }
 0x21e   :  { %v1041_v56 = vmax.f32 %v723_v54, 0.0  ;;  %v892_v10 = vpop.f32.mrf.mxu3 }
 0x21f   :  { %v1042_v11 = vmax.f32 %v892_v10, 0.0 }
 0x220   :  { %v2213_v59 = vpack.c.bf16 %v1041_v56, %v1039_v55  ;;  %v1899_v55 = vld [vmem:[#allocation2 + $0xc0] sm:$0xff] }
 0x221   :  { %v2219_v14 = vpack.c.bf16 %v1042_v11, %v1040_v9 }
 0x222   :  { %765 = vmatmul.bf16.gmra.mxu2 %v1895_v57 }
 0x223   :  { %934 = vmatmul.bf16.gmra.mxu3 %v1895_v57 }
 0x225   :  { %v2215_v61 = vpop.f32.mrf.mxu2 }
 0x226   :  { %v895_v24 = vpop.f32.mrf.mxu3 }
 0x227   :  { %v1044_v33 = vmax.f32 %v895_v24, 0.0 }
 0x22d   :  { %v728_v4 = vpop.f32.mrf.mxu2 }
 0x22e   :  { %v897_v34 = vpop.f32.mrf.mxu3  ;;  %v1045_v10 = vmax.f32 %v728_v4, 0.0 }
 0x22f   :  { %v1046_v36 = vmax.f32 %v897_v34, 0.0 }
 0x231   :  { %v2221_v38 = vpack.c.bf16 %v1046_v36, %v1044_v33  ;;  %v1043_v33 = vmax.f32 %v2215_v61, 0.0 }
 0x232   :  { %770 = vmatmul.bf16.gmra.mxu2 %v1896_v5 }
 0x233   :  { %939 = vmatmul.bf16.gmra.mxu3 %v1896_v5  ;;  %v2227_v5 = vpop.f32.mrf.mxu0 }
 0x235   :  { %v731_v8 = vpop.f32.mrf.mxu2 }
 0x236   :  { %v900_v42 = vpop.f32.mrf.mxu3  ;;  %v1047_v7 = vmax.f32 %v731_v8, 0.0  ;;  %v1900_v8 = vld [vmem:[#allocation2 + $0xc8] sm:$0xff] }
 0x237   :  { %v1048_v44 = vmax.f32 %v900_v42, 0.0 }
 0x23d   :  { %v733_v17 = vpop.f32.mrf.mxu2 }
 0x23e   :  { %v902_v46 = vpop.f32.mrf.mxu3  ;;  %v1049_v62 = vmax.f32 %v733_v17, 0.0  ;;  %v2232_v17 = vpop.f32.mrf.mxu0 }
 0x23f   :  { %v1050_v48 = vmax.f32 %v902_v46, 0.0 }
 0x240   :  { %v1165_v11 = vpack.c.bf16 %v1049_v62, %v1047_v7 }
 0x241   :  { %v2223_v49 = vpack.c.bf16 %v1050_v48, %v1048_v44 }
 0x242   :  { %775 = vmatmul.bf16.gmra.mxu2 %v1897_v20 }
 0x243   :  { %944 = vmatmul.bf16.gmra.mxu3 %v1897_v20 }
 0x245   :  { %v736_v29 = vpop.f32.mrf.mxu2 }
 0x246   :  { %v905_v58 = vpop.f32.mrf.mxu3  ;;  %v1051_v60 = vmax.f32 %v736_v29, 0.0  ;;  %v1163_v29 = vpack.c.bf16 %v1045_v10, %v1043_v33  ;;  %v2237_v44 = vpop.f32.mrf.mxu0 }
 0x247   :  { %v1052_v9 = vmax.f32 %v905_v58, 0.0 }
 0x24d   :  { %v738_v39 = vpop.f32.mrf.mxu2 }
 0x24e   :  { %v1053_v56 = vmax.f32 %v738_v39, 0.0  ;;  %v907_v20 = vpop.f32.mrf.mxu3 }
 0x24f   :  { %v1054_v24 = vmax.f32 %v907_v20, 0.0  ;;  %v1902_v20 = vld [vmem:[#allocation2 + $0xd8] sm:$0xff] }
 0x250   :  { %v1167_v1 = vpack.c.bf16 %v1053_v56, %v1051_v60 }
 0x251   :  { %v2230_v34 = vpack.c.bf16 %v1054_v24, %v1052_v9 }
 0x252   :  { %780 = vmatmul.bf16.gmra.mxu2 %v1898_v41 }
 0x253   :  { %949 = vmatmul.bf16.gmra.mxu3 %v1898_v41 }
 0x255   :  { %v741_v43 = vpop.f32.mrf.mxu2 }
 0x256   :  { %v1055_v52 = vmax.f32 %v741_v43, 0.0  ;;  %v910_v43 = vpop.f32.mrf.mxu3 }
 0x257   :  { %v1056_v61 = vmax.f32 %v910_v43, 0.0 }
 0x25d   :  { %v743_v50 = vpop.f32.mrf.mxu2 }
 0x25e   :  { %v1057_v54 = vmax.f32 %v743_v50, 0.0  ;;  %v912_v46 = vpop.f32.mrf.mxu3 }
 0x25f   :  { %v1058_v48 = vmax.f32 %v912_v46, 0.0 }
 0x260   :  { %v1169_v57 = vpack.c.bf16 %v1057_v54, %v1055_v52  ;;  %v676_v54 = vpop.f32.mrf.mxu0 }
 0x261   :  { %v2241_v50 = vpack.c.bf16 %v1058_v48, %v1056_v61  ;;  %v1903_v48 = vld [vmem:[#allocation2 + $0xe0] sm:$0xff] }
 0x262   :  { %785 = vmatmul.bf16.gmra.mxu2 %v1899_v55  ;;  %1312 = vmatpush.bf16.msra.mxu1 %v1169_v57 }
 0x263   :  { %954 = vmatmul.bf16.gmra.mxu3 %v1899_v55 }
 0x265   :  { %v746_v2 = vpop.f32.mrf.mxu2 }
 0x266   :  { %1313 = vmatpush.bf16.msra.mxu1 %v1167_v1  ;;  %v1059_v39 = vmax.f32 %v746_v2, 0.0  ;;  %v915_v58 = vpop.f32.mrf.mxu3 }
 0x267   :  { %v1060_v62 = vmax.f32 %v915_v58, 0.0 }
 0x268   :  { %v678_v60 = vpop.f32.mrf.mxu0 }
 0x26a   :  { %1314 = vmatpush.bf16.msra.mxu1 %v1165_v11 }
 0x26d   :  { %v748_v36 = vpop.f32.mrf.mxu2 }
 0x26e   :  { %v1061_v41 = vmax.f32 %v748_v36, 0.0  ;;  %1315 = vmatpush.bf16.msra.mxu1 %v1163_v29  ;;  %v917_v1 = vpop.f32.mrf.mxu3 }
 0x26f   :  { %v1062_v2 = vmax.f32 %v917_v1, 0.0  ;;  %v2256_v1 = vpop.f32.mrf.mxu1 }
 0x270   :  { %v2234_v42 = vpack.c.bf16 %v1061_v41, %v1059_v39  ;;  %v681_v9 = vpop.f32.mrf.mxu0 }
 0x272   :  { %790 = vmatmul.bf16.gmra.mxu2 %v1900_v8  ;;  %1316 = vmatpush.bf16.msra.mxu1 %v2213_v59  ;;  %v1901_v59 = vld [vmem:[#allocation2 + $0xd0] sm:$0xff] }
 0x273   :  { %959 = vmatmul.bf16.gmra.mxu3 %v1900_v8 }
 0x275   :  { %v751_v4 = vpop.f32.mrf.mxu2 }
 0x276   :  { %1317 = vmatpush.bf16.msra.mxu1 %v2209_v47  ;;  %v1063_v55 = vmax.f32 %v751_v4, 0.0 }
 0x278   :  { %v683_v29 = vpop.f32.mrf.mxu0 }
 0x27a   :  { %1318 = vmatpush.bf16.msra.mxu1 %v2205_v31  ;;  %v2246_v31 = vpack.c.bf16 %v1062_v2, %v1060_v62  ;;  %v1009_v62 = vmax.f32 %v683_v29, 0.0 }
 0x27d   :  { %v753_v52 = vpop.f32.mrf.mxu2 }
 0x27e   :  { %v1065_v56 = vmax.f32 %v753_v52, 0.0  ;;  %1319 = vmatpush.bf16.msra.mxu1 %v2201_v6  ;;  %v920_v6 = vpop.f32.mrf.mxu3 }
 0x27f   :  { %v1064_v36 = vmax.f32 %v920_v6, 0.0  ;;  %v1003_v6 = vmax.f32 %v676_v54, 0.0  ;;  %v997_v54 = vmax.f32 %v2227_v5, 0.0 }
 0x280   :  { %v2244_v57 = vpack.c.bf16 %v1065_v56, %v1063_v55  ;;  %v686_v4 = vpop.f32.mrf.mxu0 }
 0x281   :  { %v1011_v56 = vmax.f32 %v686_v4, 0.0  ;;  %v1904_v4 = vld [vmem:[#allocation2 + $0xe8] sm:$0xff] }
 0x282   :  { %795 = vmatmul.bf16.gmra.mxu2 %v1901_v59 }
 0x283   :  { %964 = vmatmul.bf16.gmra.mxu3 %v1901_v59 }
 0x285   :  { %v756_v47 = vpop.f32.mrf.mxu2 }
 0x286   :  { %v1067_v10 = vmax.f32 %v756_v47, 0.0  ;;  %v922_v39 = vpop.f32.mrf.mxu3  ;;  %v1007_v47 = vmax.f32 %v681_v9, 0.0  ;;  %v1001_v9 = vmax.f32 %v2237_v44, 0.0 }
 0x287   :  { %v1066_v41 = vmax.f32 %v922_v39, 0.0 }
 0x288   :  { %v688_v58 = vpop.f32.mrf.mxu0 }
 0x289   :  { %v2250_v8 = vpack.c.bf16 %v1066_v41, %v1064_v36  ;;  %v1013_v2 = vmax.f32 %v688_v58, 0.0  ;;  %v1145_v36 = vpack.c.bf16 %v1009_v62, %v1007_v47  ;;  %v1801_v58 = vld [vmem:[#allocation4] sm:$0xf] }
 0x28d   :  { %v758_v7 = vpop.f32.mrf.mxu2 }
 0x28e   :  { %v1069_v11 = vmax.f32 %v758_v7, 0.0  ;;  %v925_v55 = vpop.f32.mrf.mxu3 }
 0x28f   :  { %v1068_v7 = vmax.f32 %v925_v55, 0.0 }
 0x290   :  { %v2248_v24 = vpack.c.bf16 %v1069_v11, %v1067_v10  ;;  %v1147_v10 = vpack.c.bf16 %v1013_v2, %v1011_v56 }
 0x292   :  { %800 = vmatmul.bf16.gmra.mxu2 %v1902_v20  ;;  %1286 = vmatpush.bf16.msra.mxu0 %v1147_v10  ;;  %v1905_v10 = vld [vmem:[#allocation2 + $0xf0] sm:$0xff] }
 0x293   :  { %969 = vmatmul.bf16.gmra.mxu3 %v1902_v20 }
 0x295   :  { %v761_v33 = vpop.f32.mrf.mxu2 }
 0x296   :  { %v1071_v61 = vmax.f32 %v761_v33, 0.0  ;;  %v927_v11 = vpop.f32.mrf.mxu3  ;;  %v1005_v33 = vmax.f32 %v678_v60, 0.0  ;;  %1287 = vmatpush.bf16.msra.mxu0 %v1145_v36  ;;  %v1817_v36 = vld [vmem:[#allocation4 + $0x20] sm:$0xf] }
 0x297   :  { %v1070_v20 = vmax.f32 %v927_v11, 0.0 }
 0x298   :  { %v1143_v29 = vpack.c.bf16 %v1005_v33, %v1003_v6 }
 0x299   :  { %v2258_v39 = vpack.c.bf16 %v1070_v20, %v1068_v7 }
 0x29a   :  { %1288 = vmatpush.bf16.msra.mxu0 %v1143_v29 }
 0x29d   :  { %v763_v43 = vpop.f32.mrf.mxu2 }
 0x29e   :  { %v1073_v46 = vmax.f32 %v763_v43, 0.0  ;;  %v999_v43 = vmax.f32 %v2232_v17, 0.0  ;;  %v1909_v17 = vld [vmem:[#allocation4 + $0xc] sm:$0xf0] }
 0x29f   :  { %v2268_v2 = vor.u32 %v1909_v17, %v1801_v58  ;;  %v1833_v58 = vld [vmem:[#allocation4 + $0x40] sm:$0xf]  ;;  %v1917_v17 = vld [vmem:[#allocation4 + $0x4c] sm:$0xf0] }
 0x2a0   :  { %v2252_v52 = vpack.c.bf16 %v1073_v46, %v1071_v61  ;;  %v2264_v61 = vpop.f32.mrf.mxu1  ;;  %v930_v46 = vpop.f32.mrf.mxu3  ;;  %v1141_v60 = vpack.c.bf16 %v1001_v9, %v999_v43  ;;  %v1913_v43 = vld [vmem:[#allocation4 + $0x2c] sm:$0xf0] }
 0x2a1   :  { %v1072_v44 = vmax.f32 %v930_v46, 0.0  ;;  %v2281_v9 = vor.u32 %v1913_v43, %v1817_v36 }
 0x2a2   :  { %805 = vmatmul.bf16.gmra.mxu2 %v1903_v48  ;;  %1289 = vmatpush.bf16.msra.mxu0 %v1141_v60 }
 0x2a3   :  { %974 = vmatmul.bf16.gmra.mxu3 %v1903_v48  ;;  %v995_v48 = vmax.f32 %v2225_v51, 0.0 }
 0x2a5   :  { %v2254_v59 = vpop.f32.mrf.mxu2  ;;  %v1139_v56 = vpack.c.bf16 %v997_v54, %v995_v48 }
 0x2a7   :  { %1290 = vmatpush.bf16.msra.mxu0 %v1139_v56 }
 0x2a8   :  { %v932_v47 = vpop.f32.mrf.mxu3  ;;  %v2270_v7 = vpop.f32.mrf.mxu1 }
 0x2a9   :  { %v1074_v62 = vmax.f32 %v932_v47, 0.0 }
 0x2aa   :  { %1291 = vmatmul.bf16.vlgmr.msra.gmra.mxu0 %v2268_v2 }
 0x2ab   :  { %v2272_v51 = vpack.c.bf16 %v1074_v62, %v1072_v44  ;;  %v2292_v44 = vor.u32 %v1917_v17, %v1833_v58 }
 0x2ad   :  { %v2260_v41 = vpop.f32.mrf.mxu2 }
 0x2ae   :  { %v1077_v58 = vmax.f32 %v2260_v41, 0.0 }
 0x2b0   :  { %v2275_v11 = vpop.f32.mrf.mxu3  ;;  %v2277_v20 = vpop.f32.mrf.mxu1 }
 0x2b2   :  { %810 = vmatmul.bf16.gmra.mxu2 %v1904_v4 }
 0x2b3   :  { %979 = vmatmul.bf16.gmra.mxu3 %v1904_v4  ;;  %v1906_v4 = vld [vmem:[#allocation2 + $0xf8] sm:$0xff] }
 0x2b5   :  { %v771_v55 = vpop.f32.mrf.mxu2 }
 0x2b6   :  { %v1079_v27 = vmax.f32 %v771_v55, 0.0 }
 0x2b8   :  { %v2279_v33 = vpop.f32.mrf.mxu3  ;;  %v2284_v46 = vpop.f32.mrf.mxu1 }
 0x2ba   :  { %1296 = vmatmul.bf16.gmra.mxu0 %v2281_v9 }
 0x2bd   :  { %v773_v5 = vpop.f32.mrf.mxu2 }
 0x2be   :  { %v1081_v35 = vmax.f32 %v773_v5, 0.0  ;;  %v1809_v5 = vld [vmem:[#allocation4 + $0x8] sm:$0xf] }
 0x2c0   :  { %v2286_v48 = vpop.f32.mrf.mxu3  ;;  %v2288_v60 = vpop.f32.mrf.mxu1  ;;  %v1181_v17 = vpack.c.bf16 %v1081_v35, %v1079_v27 }
 0x2c2   :  { %815 = vmatmul.bf16.gmra.mxu2 %v1905_v10 }
 0x2c3   :  { %984 = vmatmul.bf16.gmra.mxu3 %v1905_v10 }
 0x2c5   :  { %v776_v6 = vpop.f32.mrf.mxu2 }
 0x2c6   :  { %v1083_v37 = vmax.f32 %v776_v6, 0.0 }
 0x2c8   :  { %v2290_v56 = vpop.f32.mrf.mxu3 }
 0x2ca   :  { %1301 = vmatmul.bf16.gmra.mxu0 %v2292_v44 }
 0x2cd   :  { %v778_v29 = vpop.f32.mrf.mxu2 }
 0x2ce   :  { %v1085_v36 = vmax.f32 %v778_v29, 0.0  ;;  %v1849_v29 = vld [vmem:[#allocation4 + $0x60] sm:$0xf] }
 0x2d0   :  { %v2295_v0 = vpop.f32.mrf.mxu3  ;;  %v1183_v32 = vpack.c.bf16 %v1085_v36, %v1083_v37  ;;  %v1910_v36 = vld [vmem:[#allocation4 + $0x14] sm:$0xf0] }
 0x2d2   :  { %820 = vmatmul.bf16.gmra.mxu2 %v1906_v4 }
 0x2d3   :  { %989 = vmatmul.bf16.gmra.mxu3 %v1906_v4  ;;  %v850_v4 = vpop.f32.mrf.mxu1 }
 0x2d5   :  { %v781_v54 = vpop.f32.mrf.mxu2 }
 0x2d6   :  { %v1087_v62 = vmax.f32 %v781_v54, 0.0  ;;  %v1075_v54 = vmax.f32 %v2254_v59, 0.0 }
 0x2d8   :  { %v2298_v25 = vpop.f32.mrf.mxu3  ;;  %v1179_v6 = vpack.c.bf16 %v1077_v58, %v1075_v54 }
 0x2dd   :  { %v783_v47 = vpop.f32.mrf.mxu2 }
 0x2de   :  { %v1089_v10 = vmax.f32 %v783_v47, 0.0  ;;  %v1921_v47 = vld [vmem:[#allocation4 + $0x6c] sm:$0xf0] }
 0x2e0   :  { %v1185_v43 = vpack.c.bf16 %v1089_v10, %v1087_v62  ;;  %v2301_v62 = vor.u32 %v1921_v47, %v1849_v29  ;;  %v852_v10 = vpop.f32.mrf.mxu1  ;;  %v950_v27 = vpop.f32.mrf.mxu3 }
 0x2e2   :  { %1341 = vmatpush.bf16.msrb.mxu0 %v1185_v43 }
 0x2e3   :  { %1306 = vmatmul.bf16.gmra.mxu0 %v2301_v62 }
 0x2e5   :  { %v786_v30 = vpop.f32.mrf.mxu2 }
 0x2e6   :  { %1342 = vmatpush.bf16.msrb.mxu0 %v1183_v32  ;;  %v1091_v37 = vmax.f32 %v786_v30, 0.0 }
 0x2e8   :  { %v855_v59 = vpop.f32.mrf.mxu1  ;;  %v952_v41 = vpop.f32.mrf.mxu3 }
 0x2ea   :  { %1343 = vmatpush.bf16.msrb.mxu0 %v1181_v17  ;;  %v2309_v17 = vor.u32 %v1910_v36, %v1809_v5  ;;  %v1006_v36 = vmax.f32 %v2288_v60, 0.0  ;;  %v998_v60 = vmax.f32 %v2264_v61, 0.0 }
 0x2ed   :  { %v788_v43 = vpop.f32.mrf.mxu2 }
 0x2ee   :  { %v1093_v55 = vmax.f32 %v788_v43, 0.0  ;;  %1344 = vmatpush.bf16.msrb.mxu0 %v1179_v6  ;;  %v1008_v43 = vmax.f32 %v850_v4, 0.0  ;;  %v1000_v4 = vmax.f32 %v2270_v7, 0.0 }
 0x2f0   :  { %v2304_v32 = vpack.c.bf16 %v1093_v55, %v1091_v37  ;;  %v955_v47 = vpop.f32.mrf.mxu3  ;;  %v1010_v37 = vmax.f32 %v852_v10, 0.0  ;;  %v1002_v10 = vmax.f32 %v2277_v20, 0.0 }
 0x2f2   :  { %1345 = vmatpush.bf16.msrb.mxu0 %v2252_v52  ;;  %v857_v52 = vpop.f32.mrf.mxu1 }
 0x2f5   :  { %v791_v35 = vpop.f32.mrf.mxu2 }
 0x2f6   :  { %1346 = vmatpush.bf16.msrb.mxu0 %v2248_v24  ;;  %v1095_v30 = vmax.f32 %v791_v35, 0.0  ;;  %v1012_v24 = vmax.f32 %v855_v59, 0.0  ;;  %v1092_v35 = vmax.f32 %v955_v47, 0.0 }
 0x2fa   :  { %1347 = vmatpush.bf16.msrb.mxu0 %v2244_v57  ;;  %v1014_v57 = vmax.f32 %v857_v52, 0.0 }
 0x2fc   :  { %v1148_v55 = vpack.c.bf16 %v1014_v57, %v1012_v24  ;;  %v1142_v24 = vpack.c.bf16 %v1002_v10, %v1000_v4  ;;  %v1088_v57 = vmax.f32 %v950_v27, 0.0 }
 0x2fd   :  { %v793_v58 = vpop.f32.mrf.mxu2 }
 0x2fe   :  { %v1097_v54 = vmax.f32 %v793_v58, 0.0  ;;  %1348 = vmatpush.bf16.msrb.mxu0 %v2234_v42  ;;  %v957_v42 = vpop.f32.mrf.mxu3  ;;  %v1146_v58 = vpack.c.bf16 %v1010_v37, %v1008_v43  ;;  %v1090_v43 = vmax.f32 %v952_v41, 0.0  ;;  %v1080_v41 = vmax.f32 %v2286_v48, 0.0  ;;  %v1911_v48 = vld [vmem:[#allocation4 + $0x24] sm:$0xf] }
 0x2ff   :  { %v1094_v5 = vmax.f32 %v957_v42, 0.0  ;;  %v1084_v42 = vmax.f32 %v2295_v0, 0.0  ;;  %v1076_v0 = vmax.f32 %v2275_v11, 0.0 }
 0x300   :  { %v2313_v29 = vpack.c.bf16 %v1097_v54, %v1095_v30 }
 0x301   :  { %1349 = vmatmul.bf16.vlgmr.msrb.gmra.mxu0 %v2309_v17  ;;  %v2320_v30 = vpack.c.bf16 %v1094_v5, %v1092_v35  ;;  %v1086_v5 = vmax.f32 %v2298_v25, 0.0  ;;  %v1078_v25 = vmax.f32 %v2279_v33, 0.0 }
 0x302   :  { %1399 = vmatpush.bf16.msra.mxu0 %v2203_v12  ;;  %v1004_v12 = vmax.f32 %v2284_v46, 0.0  ;;  %v996_v46 = vmax.f32 %v2256_v1, 0.0 }
 0x304   :  { %v1144_v52 = vpack.c.bf16 %v1006_v36, %v1004_v12  ;;  %v1140_v7 = vpack.c.bf16 %v998_v60, %v996_v46  ;;  %v1186_v12 = vpack.c.bf16 %v1090_v43, %v1088_v57  ;;  %v1082_v36 = vmax.f32 %v2290_v56, 0.0  ;;  %v1819_v56 = vld [vmem:[#allocation4 + $0x30] sm:$0xf0]  ;;  %v1825_v57 = vld [vmem:[#allocation4 + $0x28] sm:$0xf] }
 0x305   :  { %v796_v6 = vpop.f32.mrf.mxu2  ;;  %v2343_v60 = vor.u32 %v1911_v48, %v1819_v56  ;;  %v1914_v43 = vld [vmem:[#allocation4 + $0x34] sm:$0xf0] }
 0x306   :  { %1400 = vmatpush.bf16.msra.mxu0 %v2199_v63  ;;  %v1099_v63 = vmax.f32 %v796_v6, 0.0  ;;  %v960_v47 = vpop.f32.mrf.mxu3  ;;  %v1907_v6 = vld [vmem:[#allocation4 + $0x4] sm:$0xf]  ;;  %v1182_v4 = vpack.c.bf16 %v1082_v36, %v1080_v41  ;;  %v2346_v33 = vor.u32 %v1914_v43, %v1825_v57  ;;  %v1918_v41 = vld [vmem:[#allocation4 + $0x54] sm:$0xf0] }
 0x307   :  { %v1096_v20 = vmax.f32 %v960_v47, 0.0  ;;  %v1180_v47 = vpack.c.bf16 %v1078_v25, %v1076_v0  ;;  %v1857_v25 = vld [vmem:[#allocation4 + $0x68] sm:$0xf] }
 0x30a   :  { %1401 = vmatpush.bf16.msra.mxu0 %v2197_v45 }
 0x30d   :  { %v798_v59 = vpop.f32.mrf.mxu2 }
 0x30e   :  { %1402 = vmatpush.bf16.msra.mxu0 %v1148_v55  ;;  %v1101_v54 = vmax.f32 %v798_v59, 0.0  ;;  %v1803_v55 = vld [vmem:[#allocation4 + $0x10] sm:$0xf0]  ;;  %v962_v1 = vpop.f32.mrf.mxu3 }
 0x30f   :  { %v2328_v35 = vor.u32 %v1907_v6, %v1803_v55  ;;  %v1098_v61 = vmax.f32 %v962_v1, 0.0 }
 0x310   :  { %v2324_v45 = vpack.c.bf16 %v1101_v54, %v1099_v63 }
 0x311   :  { %1320 = vmatmul.bf16.vlgmr.msra.gmra.mxu1 %v2328_v35  ;;  %v2333_v27 = vpack.c.bf16 %v1098_v61, %v1096_v20  ;;  %1354 = vmatmul.bf16.gmra.mxu0 %v2346_v33  ;;  %v1841_v61 = vld [vmem:[#allocation4 + $0x48] sm:$0xf] }
 0x312   :  { %1403 = vmatpush.bf16.msra.mxu0 %v1146_v58  ;;  %v1184_v58 = vpack.c.bf16 %v1086_v5, %v1084_v42  ;;  %v1915_v42 = vld [vmem:[#allocation4 + $0x44] sm:$0xf]  ;;  %v1835_v5 = vld [vmem:[#allocation4 + $0x50] sm:$0xf0] }
 0x315   :  { %v801_v37 = vpop.f32.mrf.mxu2 }
 0x316   :  { %1404 = vmatpush.bf16.msra.mxu0 %v1144_v52  ;;  %v1103_v63 = vmax.f32 %v801_v37, 0.0  ;;  %v965_v52 = vpop.f32.mrf.mxu3 }
 0x31a   :  { %1405 = vmatpush.bf16.msra.mxu0 %v1142_v24  ;;  %v1100_v24 = vmax.f32 %v965_v52, 0.0 }
 0x31d   :  { %v803_v59 = vpop.f32.mrf.mxu2 }
 0x31e   :  { %1406 = vmatpush.bf16.msra.mxu0 %v1140_v7  ;;  %v1105_v54 = vmax.f32 %v803_v59, 0.0  ;;  %v967_v11 = vpop.f32.mrf.mxu3 }
 0x31f   :  { %v1102_v37 = vmax.f32 %v967_v11, 0.0 }
 0x320   :  { %v2339_v10 = vpack.c.bf16 %v1105_v54, %v1103_v63  ;;  %v1919_v63 = vld [vmem:[#allocation4 + $0x64] sm:$0xf]  ;;  %v1851_v54 = vld [vmem:[#allocation4 + $0x70] sm:$0xf0] }
 0x321   :  { %1325 = vmatmul.bf16.gmra.mxu1 %v2343_v60  ;;  %v2349_v6 = vpack.c.bf16 %v1102_v37, %v1100_v24  ;;  %v2363_v0 = vor.u32 %v1919_v63, %v1851_v54 }
 0x322   :  { %1457 = vmatpush.bf16.msrb.mxu0 %v1186_v12  ;;  %v2354_v12 = vor.u32 %v1915_v42, %v1835_v5 }
 0x325   :  { %v2341_v46 = vpop.f32.mrf.mxu2 }
 0x326   :  { %1458 = vmatpush.bf16.msrb.mxu0 %v1184_v58  ;;  %v970_v7 = vpop.f32.mrf.mxu3 }
 0x327   :  { %v1104_v1 = vmax.f32 %v970_v7, 0.0  ;;  %v1292_v24 = vpop.f32.mrf.mxu0 }
 0x32a   :  { %1459 = vmatpush.bf16.msrb.mxu0 %v1182_v4  ;;  %v1922_v4 = vld [vmem:[#allocation4 + $0x74] sm:$0xf0] }
 0x32d   :  { %v808_v55 = vpop.f32.mrf.mxu2 }
 0x32e   :  { %1460 = vmatpush.bf16.msrb.mxu0 %v1180_v47  ;;  %v972_v36 = vpop.f32.mrf.mxu3  ;;  %v1109_v63 = vmax.f32 %v808_v55, 0.0  ;;  %v1908_v55 = vld [vmem:[#allocation4 + $0xc] sm:$0xf] }
 0x32f   :  { %v1106_v58 = vmax.f32 %v972_v36, 0.0  ;;  %v2376_v7 = vpop.f32.mrf.mxu0 }
 0x331   :  { %1330 = vmatmul.bf16.gmra.mxu1 %v2354_v12 }
 0x332   :  { %1461 = vmatpush.bf16.msrb.mxu0 %v2272_v51  ;;  %v2358_v51 = vor.u32 %v1918_v41, %v1841_v61 }
 0x334   :  { %1359 = vmatmul.bf16.gmra.mxu0 %v2358_v51 }
 0x335   :  { %v811_v20 = vpop.f32.mrf.mxu2 }
 0x336   :  { %1462 = vmatpush.bf16.msrb.mxu0 %v2258_v39  ;;  %v2361_v39 = vpack.c.bf16 %v1106_v58, %v1104_v1  ;;  %v2369_v52 = vpop.f32.mrf.mxu3  ;;  %v1111_v36 = vmax.f32 %v811_v20, 0.0 }
 0x337   :  { %v2378_v58 = vpop.f32.mrf.mxu0 }
 0x33a   :  { %1463 = vmatpush.bf16.msrb.mxu0 %v2250_v8 }
 0x33d   :  { %v813_v8 = vpop.f32.mrf.mxu2 }
 0x33e   :  { %1464 = vmatpush.bf16.msrb.mxu0 %v2246_v31  ;;  %v2366_v31 = vor.u32 %v1922_v4, %v1857_v25  ;;  %v2371_v56 = vpop.f32.mrf.mxu3  ;;  %v1113_v61 = vmax.f32 %v813_v8, 0.0  ;;  %v1107_v25 = vmax.f32 %v2341_v46, 0.0 }
 0x340   :  { %v1197_v54 = vpack.c.bf16 %v1113_v61, %v1111_v36  ;;  %v1195_v4 = vpack.c.bf16 %v1109_v63, %v1107_v25  ;;  %v1843_v61 = vld [vmem:[#allocation4 + $0x58] sm:$0xf0] }
 0x341   :  { %1335 = vmatmul.bf16.gmra.mxu1 %v2363_v0 }
 0x344   :  { %1364 = vmatmul.bf16.gmra.mxu0 %v2366_v31 }
 0x345   :  { %v816_v59 = vpop.f32.mrf.mxu2 }
 0x346   :  { %v2374_v37 = vpop.f32.mrf.mxu3  ;;  %v1115_v1 = vmax.f32 %v816_v59, 0.0  ;;  %v1811_v59 = vld [vmem:[#allocation4 + $0x18] sm:$0xf0] }
 0x347   :  { %v2390_v46 = vor.u32 %v1908_v55, %v1811_v59  ;;  %v1920_v59 = vld [vmem:[#allocation4 + $0x6c] sm:$0xf] }
 0x34d   :  { %v818_v47 = vpop.f32.mrf.mxu2 }
 0x34e   :  { %v1117_v42 = vmax.f32 %v818_v47, 0.0  ;;  %v2382_v47 = vpop.f32.mrf.mxu0 }
 0x350   :  { %v1199_v41 = vpack.c.bf16 %v1117_v42, %v1115_v1  ;;  %v1916_v1 = vld [vmem:[#allocation4 + $0x4c] sm:$0xf] }
 0x351   :  { %v2414_v36 = vor.u32 %v1916_v1, %v1843_v61 }
 0x354   :  { %1407 = vmatmul.bf16.vlgmr.msra.gmra.mxu0 %v2268_v2  ;;  %v982_v2 = vpop.f32.mrf.mxu3 }
 0x355   :  { %v821_v48 = vpop.f32.mrf.mxu2 }
 0x356   :  { %v1119_v43 = vmax.f32 %v821_v48, 0.0  ;;  %v2386_v20 = vpop.f32.mrf.mxu0 }
 0x35c   :  { %v985_v8 = vpop.f32.mrf.mxu3 }
 0x35d   :  { %v823_v57 = vpop.f32.mrf.mxu2 }
 0x35e   :  { %v1121_v11 = vmax.f32 %v823_v57, 0.0  ;;  %v2394_v48 = vpop.f32.mrf.mxu0 }
 0x360   :  { %v1201_v5 = vpack.c.bf16 %v1121_v11, %v1119_v43 }
 0x362   :  { %1370 = vmatpush.bf16.msrb.mxu1 %v1201_v5 }
 0x364   :  { %1412 = vmatmul.bf16.gmra.mxu0 %v2281_v9  ;;  %v987_v9 = vpop.f32.mrf.mxu3 }
 0x365   :  { %v1118_v42 = vmax.f32 %v987_v9, 0.0 }
 0x366   :  { %1371 = vmatpush.bf16.msrb.mxu1 %v1199_v41  ;;  %v1114_v41 = vmax.f32 %v982_v2, 0.0 }
 0x36a   :  { %1372 = vmatpush.bf16.msrb.mxu1 %v1197_v54  ;;  %v1108_v54 = vmax.f32 %v2369_v52, 0.0 }
 0x36e   :  { %1373 = vmatpush.bf16.msrb.mxu1 %v1195_v4 }
 0x372   :  { %1374 = vmatpush.bf16.msrb.mxu1 %v2339_v10  ;;  %v1912_v10 = vld [vmem:[#allocation4 + $0x2c] sm:$0xf] }
 0x374   :  { %1417 = vmatmul.bf16.gmra.mxu0 %v2292_v44  ;;  %v1827_v44 = vld [vmem:[#allocation4 + $0x38] sm:$0xf0] }
 0x376   :  { %1375 = vmatpush.bf16.msrb.mxu1 %v2324_v45  ;;  %v2399_v45 = vpop.f32.mrf.mxu0 }
 0x37a   :  { %1376 = vmatpush.bf16.msrb.mxu1 %v2313_v29  ;;  %v990_v29 = vpop.f32.mrf.mxu3 }
 0x37e   :  { %1377 = vmatpush.bf16.msrb.mxu1 %v2304_v32  ;;  %v2403_v32 = vor.u32 %v1912_v10, %v1827_v44 }
 0x381   :  { %1378 = vmatmul.bf16.vlgmr.msrb.gmra.mxu1 %v2390_v46 }
 0x382   :  { %1428 = vmatpush.bf16.msra.mxu1 %v2241_v50  ;;  %v2406_v50 = vpop.f32.mrf.mxu0 }
 0x384   :  { %1422 = vmatmul.bf16.gmra.mxu0 %v2301_v62  ;;  %v1116_v62 = vmax.f32 %v985_v8, 0.0 }
 0x386   :  { %1429 = vmatpush.bf16.msra.mxu1 %v2230_v34  ;;  %v992_v34 = vpop.f32.mrf.mxu3 }
 0x387   :  { %v1122_v57 = vmax.f32 %v992_v34, 0.0 }
 0x38a   :  { %1430 = vmatpush.bf16.msra.mxu1 %v2223_v49  ;;  %v1120_v49 = vmax.f32 %v990_v29, 0.0  ;;  %v1350_v11 = vpop.f32.mrf.mxu0 }
 0x38e   :  { %1431 = vmatpush.bf16.msra.mxu1 %v2221_v38  ;;  %v1321_v43 = vpop.f32.mrf.mxu1  ;;  %v1202_v38 = vpack.c.bf16 %v1122_v57, %v1120_v49 }
 0x38f   :  { %v1322_v5 = vadd.f32 %v1321_v43, %v1292_v24  ;;  %v1110_v24 = vmax.f32 %v2371_v56, 0.0 }
 0x391   :  { %1383 = vmatmul.bf16.gmra.mxu1 %v2403_v32 }
 0x392   :  { %1432 = vmatpush.bf16.msra.mxu1 %v2219_v14  ;;  %v1112_v14 = vmax.f32 %v2374_v37, 0.0  ;;  %v1352_v25 = vpop.f32.mrf.mxu0 }
 0x394   :  { %1465 = vmatmul.bf16.vlgmr.msrb.gmra.mxu0 %v2309_v17  ;;  %v1198_v4 = vpack.c.bf16 %v1114_v41, %v1112_v14  ;;  %v1351_v17 = vadd.f32 %v1350_v11, %v1322_v5 }
 0x396   :  { %1433 = vmatpush.bf16.msra.mxu1 %v2217_v3  ;;  %v1200_v3 = vpack.c.bf16 %v1118_v42, %v1116_v62  ;;  %v1323_v63 = vpop.f32.mrf.mxu1 }
 0x39a   :  { %1434 = vmatpush.bf16.msra.mxu1 %v2211_v53  ;;  %v1324_v53 = vadd.f32 %v1323_v63, %v2376_v7  ;;  %v1355_v55 = vpop.f32.mrf.mxu0  ;;  %v1859_v7 = vld [vmem:[#allocation4 + $0x78] sm:$0xf0] }
 0x39b   :  { %v2423_v52 = vor.u32 %v1920_v59, %v1859_v7 }
 0x39c   :  { %v1353_v8 = vadd.f32 %v1352_v25, %v1324_v53 }
 0x39e   :  { %1435 = vmatpush.bf16.msra.mxu1 %v2207_v40  ;;  %v1196_v40 = vpack.c.bf16 %v1110_v24, %v1108_v54  ;;  %v1326_v37 = vpop.f32.mrf.mxu1 }
 0x39f   :  { %v1327_v2 = vadd.f32 %v1326_v37, %v2378_v58 }
 0x3a1   :  { %1388 = vmatmul.bf16.gmra.mxu1 %v2414_v36  ;;  %v1356_v10 = vadd.f32 %v1355_v55, %v1327_v2 }
 0x3a2   :  { %1486 = vmatpush.bf16.msrb.mxu1 %v1202_v38  ;;  %v1357_v29 = vpop.f32.mrf.mxu0 }
 0x3a4   :  { %1470 = vmatmul.bf16.gmra.mxu0 %v2346_v33 }
 0x3a6   :  { %1487 = vmatpush.bf16.msrb.mxu1 %v1200_v3  ;;  %v1328_v56 = vpop.f32.mrf.mxu1 }
 0x3a7   :  { %v1329_v9 = vadd.f32 %v1328_v56, %v2382_v47 }
 0x3a9   :  { %v1358_v44 = vadd.f32 %v1357_v29, %v1329_v9 }
 0x3aa   :  { %1488 = vmatpush.bf16.msrb.mxu1 %v1198_v4 }
 0x3ae   :  { %1489 = vmatpush.bf16.msrb.mxu1 %v1196_v40  ;;  %v1331_v58 = vpop.f32.mrf.mxu1 }
 0x3af   :  { %v1332_v34 = vadd.f32 %v1331_v58, %v2386_v20 }
 0x3b1   :  { %1393 = vmatmul.bf16.gmra.mxu1 %v2423_v52  ;;  %v1360_v33 = vpop.f32.mrf.mxu0 }
 0x3b2   :  { %1490 = vmatpush.bf16.msrb.mxu1 %v2361_v39  ;;  %v1361_v57 = vadd.f32 %v1360_v33, %v1332_v34 }
 0x3b4   :  { %1475 = vmatmul.bf16.gmra.mxu0 %v2358_v51 }
 0x3b6   :  { %1491 = vmatpush.bf16.msrb.mxu1 %v2349_v6  ;;  %v1333_v39 = vpop.f32.mrf.mxu1 }
 0x3b7   :  { %v1334_v47 = vadd.f32 %v1333_v39, %v2394_v48 }
 0x3b9   :  { %v1362_v49 = vpop.f32.mrf.mxu0 }
 0x3ba   :  { %1492 = vmatpush.bf16.msrb.mxu1 %v2333_v27  ;;  %v1363_v6 = vadd.f32 %v1362_v49, %v1334_v47 }
 0x3be   :  { %1493 = vmatpush.bf16.msrb.mxu1 %v2320_v30  ;;  %v1336_v43 = vpop.f32.mrf.mxu1 }
 0x3bf   :  { %v1337_v11 = vadd.f32 %v1336_v43, %v2399_v45 }
 0x3c1   :  { %1436 = vmatmul.bf16.vlgmr.msra.gmra.mxu1 %v2328_v35  ;;  %v1365_v27 = vpop.f32.mrf.mxu0 }
 0x3c2   :  { %v1366_v42 = vadd.f32 %v1365_v27, %v1337_v11 }
 0x3c4   :  { %1480 = vmatmul.bf16.gmra.mxu0 %v2366_v31 }
 0x3c6   :  { %v1338_v20 = vpop.f32.mrf.mxu1 }
 0x3c7   :  { %v1339_v62 = vadd.f32 %v1338_v20, %v2406_v50 }
 0x3c9   :  { %v1367_v30 = vpop.f32.mrf.mxu0 }
 0x3ca   :  { %v1368_v51 = vadd.f32 %v1367_v30, %v1339_v62 }
 0x3d1   :  { %1441 = vmatmul.bf16.gmra.mxu1 %v2343_v60 }
 0x3e1   :  { %1446 = vmatmul.bf16.gmra.mxu1 %v2354_v12 }
 0x3f1   :  { %1451 = vmatmul.bf16.gmra.mxu1 %v2363_v0 }
 0x3fe   :  { %v1379_v48 = vpop.f32.mrf.mxu1 }
 0x3ff   :  { %v1380_v35 = vadd.f32 %v1379_v48, %v1351_v17 }
 0x401   :  { %1494 = vmatmul.bf16.vlgmr.msrb.gmra.mxu1 %v2390_v46  ;;  %v1515_v31 = vmul.f32 %v1380_v35, %v2165_v13  ;;  %v1408_v46 = vpop.f32.mrf.mxu0 }
 0x406   :  { %v1381_v45 = vpop.f32.mrf.mxu1 }
 0x407   :  { %v1382_v38 = vadd.f32 %v1381_v45, %v1353_v8 }
 0x409   :  { %v1517_v5 = vmul.f32 %v1382_v38, %v2167_v15  ;;  %v1410_v54 = vpop.f32.mrf.mxu0 }
 0x40b   :  { %v1531_v50 = vadd.f32 %v1517_v5, %v1515_v31 }
 0x40e   :  { %v1384_v1 = vpop.f32.mrf.mxu1 }
 0x40f   :  { %v1385_v61 = vadd.f32 %v1384_v1, %v1356_v10 }
 0x411   :  { %v1519_v14 = vmul.f32 %v1385_v61, %v2169_v16  ;;  %1499 = vmatmul.bf16.gmra.mxu1 %v2403_v32  ;;  %v1413_v8 = vpop.f32.mrf.mxu0 }
 0x413   :  { %v1532_v60 = vadd.f32 %v1531_v50, %v1519_v14  ;;  %v2481_v50 = vld [vmem:[#allocation8_spill] sm:$0xff] }
 0x416   :  { %v1386_v12 = vpop.f32.mrf.mxu1 }
 0x417   :  { %v1387_v0 = vadd.f32 %v1386_v12, %v1358_v44 }
 0x419   :  { %v1521_v41 = vmul.f32 %v1387_v0, %v2171_v18 }
 0x41b   :  { %v1533_v3 = vadd.f32 %v1532_v60, %v1521_v41 }
 0x41e   :  { %v1389_v63 = vpop.f32.mrf.mxu1 }
 0x41f   :  { %v1390_v53 = vadd.f32 %v1389_v63, %v1361_v57 }
 0x421   :  { %v1523_v13 = vmul.f32 %v1390_v53, %v2175_v21  ;;  %1504 = vmatmul.bf16.gmra.mxu1 %v2414_v36  ;;  %v1415_v36 = vpop.f32.mrf.mxu0 }
 0x423   :  { %v1534_v15 = vadd.f32 %v1533_v3, %v1523_v13  ;;  %v2482_v3 = vld [vmem:[#allocation9_spill] sm:$0xff] }
 0x426   :  { %v1391_v25 = vpop.f32.mrf.mxu1 }
 0x427   :  { %v1392_v24 = vadd.f32 %v1391_v25, %v1363_v6 }
 0x429   :  { %v1525_v16 = vmul.f32 %v1392_v24, %v2179_v23  ;;  %v1418_v7 = vpop.f32.mrf.mxu0 }
 0x42b   :  { %v1535_v32 = vadd.f32 %v1534_v15, %v1525_v16 }
 0x42e   :  { %v1394_v4 = vpop.f32.mrf.mxu1 }
 0x42f   :  { %v1395_v17 = vadd.f32 %v1394_v4, %v1366_v42 }
 0x431   :  { %v1527_v18 = vmul.f32 %v1395_v17, %v2183_v26  ;;  %1509 = vmatmul.bf16.gmra.mxu1 %v2423_v52  ;;  %v1420_v23 = vpop.f32.mrf.mxu0 }
 0x433   :  { %v1536_v40 = vadd.f32 %v1535_v32, %v1527_v18 }
 0x436   :  { %v1396_v37 = vpop.f32.mrf.mxu1 }
 0x437   :  { %v1397_v2 = vadd.f32 %v1396_v37, %v1368_v51 }
 0x439   :  { %v1529_v21 = vmul.f32 %v1397_v2, %v2187_v28  ;;  %v1423_v10 = vpop.f32.mrf.mxu0 }
 0x43b   :  { %v2452_v55 = vadd.f32 %v1536_v40, %v1529_v21 }
 0x43e   :  { %v1437_v59 = vpop.f32.mrf.mxu1 }
 0x43f   :  { %v1438_v28 = vadd.f32 %v1437_v59, %v1408_v46  ;;  %v2485_v59 = vld [vmem:[#allocation12_spill] sm:$0xff] }
 0x441   :  { %v1425_v58 = vpop.f32.mrf.mxu0 }
 0x446   :  { %v1439_v56 = vpop.f32.mrf.mxu1 }
 0x447   :  { %v1440_v6 = vadd.f32 %v1439_v56, %v1410_v54  ;;  %v2483_v54 = vld [vmem:[#allocation10_spill] sm:$0xff] }
 0x449   :  { %v1466_v34 = vpop.f32.mrf.mxu0 }
 0x44a   :  { %v1467_v43 = vadd.f32 %v1466_v34, %v1438_v28  ;;  %v2486_v34 = vld [vmem:[#allocation13_spill] sm:$0xff] }
 0x44e   :  { %v1442_v9 = vpop.f32.mrf.mxu1 }
 0x44f   :  { %v1443_v30 = vadd.f32 %v1442_v9, %v1413_v8  ;;  %v2484_v8 = vld [vmem:[#allocation11_spill] sm:$0xff] }
 0x451   :  { %v1468_v39 = vpop.f32.mrf.mxu0 }
 0x452   :  { %v1469_v11 = vadd.f32 %v1468_v39, %v1440_v6 }
 0x456   :  { %v1444_v29 = vpop.f32.mrf.mxu1 }
 0x457   :  { %v1445_v5 = vadd.f32 %v1444_v29, %v1415_v36 }
 0x459   :  { %v1471_v57 = vpop.f32.mrf.mxu0 }
 0x45a   :  { %v1472_v45 = vadd.f32 %v1471_v57, %v1443_v30 }
 0x45e   :  { %v1447_v44 = vpop.f32.mrf.mxu1 }
 0x45f   :  { %v1448_v41 = vadd.f32 %v1447_v44, %v1418_v7 }
 0x461   :  { %v1473_v48 = vpop.f32.mrf.mxu0 }
 0x462   :  { %v1474_v60 = vadd.f32 %v1473_v48, %v1445_v5 }
 0x466   :  { %v1449_v26 = vpop.f32.mrf.mxu1 }
 0x467   :  { %v1450_v15 = vadd.f32 %v1449_v26, %v1420_v23  ;;  %v1538_v23 = vrot.slane %v2452_v55, 4 }
 0x469   :  { %v1476_v14 = vpop.f32.mrf.mxu0  ;;  %v1539_v26 = vadd.f32 %v1538_v23, %v2452_v55 }
 0x46e   :  { %v1452_v52 = vpop.f32.mrf.mxu1 }
 0x46f   :  { %v1453_v33 = vadd.f32 %v1452_v52, %v1423_v10 }
 0x471   :  { %v1478_v53 = vpop.f32.mrf.mxu0 }
 0x472   :  { %v1479_v16 = vadd.f32 %v1478_v53, %v1450_v15 }
 0x476   :  { %v1454_v47 = vpop.f32.mrf.mxu1 }
 0x477   :  { %v1455_v36 = vadd.f32 %v1454_v47, %v1425_v58 }
 0x479   :  { %v1481_v17 = vpop.f32.mrf.mxu0 }
 0x47a   :  { %v1482_v37 = vadd.f32 %v1481_v17, %v1453_v33 }
 0x47e   :  { %v1495_v49 = vpop.f32.mrf.mxu1 }
 0x47f   :  { %v1496_v27 = vadd.f32 %v1495_v49, %v1467_v43  ;;  %v1540_v49 = vrot.slane %v1539_v26, 2 }
 0x481   :  { %v1516_v42 = vmul.f32 %v1496_v27, %v2173_v19  ;;  %v1477_v19 = vadd.f32 %v1476_v14, %v1448_v41  ;;  %v1483_v56 = vpop.f32.mrf.mxu0  ;;  %v1541_v57 = vadd.f32 %v1540_v49, %v1539_v26 }
 0x482   :  { %v1484_v29 = vadd.f32 %v1483_v56, %v1455_v36 }
 0x483   :  { %v1542_v47 = vrot.slane %v1541_v57, 1 }
 0x485   :  { %v1543_v27 = vadd.f32 %v1542_v47, %v1541_v57 }
 0x486   :  { %v1497_v20 = vpop.f32.mrf.mxu1 }
 0x487   :  { %v1498_v62 = vadd.f32 %v1497_v20, %v1469_v11 }
 0x489   :  { %v1518_v51 = vmul.f32 %v1498_v62, %v2177_v22  ;;  %v2487_v62 = vlaneseq }
 0x48b   :  { %v1544_v35 = vadd.f32 %v1518_v51, %v1516_v42  ;;  %vm1565_vm5 = vcmp.lt.s32.totalorder %v2487_v62, 256 }
 0x48e   :  { %v1500_v38 = vpop.f32.mrf.mxu1 }
 0x48f   :  { %v1501_v31 = vadd.f32 %v1500_v38, %v1472_v45 }
 0x491   :  { %v1520_v1 = vmul.f32 %v1501_v31, %v2481_v50 }
 0x493   :  { %v1545_v61 = vadd.f32 %v1544_v35, %v1520_v1 }
 0x496   :  { %v1502_v12 = vpop.f32.mrf.mxu1 }
 0x497   :  { %v1503_v0 = vadd.f32 %v1502_v12, %v1474_v60 }
 0x499   :  { %v1522_v46 = vmul.f32 %v1503_v0, %v2482_v3 }
 0x49b   :  { %v1546_v63 = vadd.f32 %v1545_v61, %v1522_v46 }
 0x49e   :  { %v1505_v22 = vpop.f32.mrf.mxu1 }
 0x49f   :  { %v1506_v13 = vadd.f32 %v1505_v22, %v1477_v19 }
 0x4a1   :  { %v1524_v25 = vmul.f32 %v1506_v13, %v2483_v54 }
 0x4a3   :  { %v1547_v24 = vadd.f32 %v1546_v63, %v1524_v25 }
 0x4a6   :  { %v1507_v32 = vpop.f32.mrf.mxu1 }
 0x4a7   :  { %v1508_v4 = vadd.f32 %v1507_v32, %v1479_v16 }
 0x4a9   :  { %v1526_v18 = vmul.f32 %v1508_v4, %v2484_v8 }
 0x4ab   :  { %v1548_v40 = vadd.f32 %v1547_v24, %v1526_v18 }
 0x4ae   :  { %v1510_v2 = vpop.f32.mrf.mxu1 }
 0x4af   :  { %v1511_v21 = vadd.f32 %v1510_v2, %v1482_v37 }
 0x4b1   :  { %v1528_v7 = vmul.f32 %v1511_v21, %v2485_v59 }
 0x4b3   :  { %v1549_v9 = vadd.f32 %v1548_v40, %v1528_v7 }
 0x4b6   :  { %v1512_v10 = vpop.f32.mrf.mxu1 }
 0x4b7   :  { %v1513_v44 = vadd.f32 %v1512_v10, %v1484_v29 }
 0x4b9   :  { %v1530_v52 = vmul.f32 %v1513_v44, %v2486_v34 }
 0x4bb   :  { %v1550_v39 = vadd.f32 %v1549_v9, %v1530_v52 }
 0x4bd   :  { %v1551_v28 = vrot.slane %v1550_v39, 4 }
 0x4bf   :  { %v1552_v33 = vadd.f32 %v1551_v28, %v1550_v39 }
 0x4c1   :  { %v1553_v6 = vrot.slane %v1552_v33, 2 }
 0x4c3   :  { %v1554_v58 = vadd.f32 %v1553_v6, %v1552_v33 }
 0x4c5   :  { %v1555_v43 = vrot.slane %v1554_v58, 1 }
 0x4c7   :  { %v1556_v11 = vadd.f32 %v1555_v43, %v1554_v58 }
 0x4c9   :  { %v1559_v20 = vrot.slane %v1556_v11, 7 }
 0x4cb   :  { %v1561_v30 = vsel %vm1560_vm4, %v1543_v27, %v1559_v20 }
 0x4cc   :  { %1567 = vst.msk [vmem:[%s2473_s5] sm:$0x3] %vm1565_vm5, %v1561_v30 }
 0x4cd   :  { %1572 = vsyncpa [#allocation3], 1 }
 0x4ce   :  { %1573 = vsyncpa [#allocation5], 1 }

</bundles_post_ra>
